<compile_context>
chip_gen: v7x
topology: tpu7x:2x2x1
jax: 0.10.0
libtpu: 0.0.40
codegen_flags: <defaults>
</compile_context>

<pallas_src>
import math
import jax
import jax.numpy as jnp
from jax.experimental import pallas as pl
from jax.experimental.pallas import tpu as pltpu

# ----------------------------- config ---------------------------------------
B = 2          # batch
S = 8          # sequence length
H = 32         # hidden size
NH = 4         # attention heads
DH = H // NH   # head dim
I = 64         # intermediate (FFN) size
L = 2          # num labels
VOCAB = 100
MAXPOS = 32
NTYPE = 2
NLAYERS = 2
LN_EPS = 1e-12

VROWS = 8        # rows in the packed per-layer vector block
VW = 3 * H       # packed-vector width (max of 3H=96, I=64, H=32)
# packed row indices: 0 bqkv | 1 bo | 2 ln1_g | 3 ln1_b | 4 b1 | 5 b2 | 6 ln2_g | 7 ln2_b


# ----------------------------- helpers ---------------------------------------
def _ln(x, gamma, beta):
    # LayerNorm statistics in f32.
    mu = jnp.mean(x, axis=-1, keepdims=True)
    var = jnp.mean((x - mu) ** 2, axis=-1, keepdims=True)
    return (x - mu) * jax.lax.rsqrt(var + LN_EPS) * gamma + beta


def _gelu(x):
    # TODO(synk): bert-base-uncased uses exact erf GELU; tanh approximation
    # used here for guaranteed Mosaic lowering (numerically very close).
    c = math.sqrt(2.0 / math.pi)
    return 0.5 * x * (1.0 + jnp.tanh(c * (x + 0.044715 * x * x * x)))


# ----------------------------- kernel ---------------------------------------
def encoder_head_kernel(emb_ref, eg_ref, eb_ref,
                        wqkv_ref, wo_ref, w1_ref, w2_ref, vec_ref,
                        wp_ref, bp_ref, wc_ref, bc_ref, onehot_ref,
                        loss_ref, logits_ref, x_ref):
    """One grid step == one transformer layer.

    x_ref (VMEM scratch) carries the activation across layers; step 0 also
    applies the embedding LayerNorm, the last step also runs pooler +
    classifier + cross-entropy and writes loss/logits.
    """
    layer = pl.program_id(0)

    # Fuse the embedding LayerNorm into the first grid step.
    @pl.when(layer == 0)
    def _():
        x_ref[...] = _ln(emb_ref[...], eg_ref[...], eb_ref[...])

    x = x_ref[...]                       # (B, S, H) f32, resident across layers
    xb = x.astype(jnp.bfloat16)

    # --- packed per-layer bias / LayerNorm vectors (one DMA per step) --------
    vec = vec_ref[...]                   # (VROWS, VW) f32
    bqkv = vec[0:1, 0:3 * H]
    bo = vec[1:2, 0:H]
    g1 = vec[2:3, 0:H]
    be1 = vec[3:4, 0:H]
    b1 = vec[4:5, 0:I]
    b2 = vec[5:6, 0:H]
    g2 = vec[6:7, 0:H]
    be2 = vec[7:8, 0:H]

    # --- fused QKV projection: one wide bf16 MXU matmul ----------------------
    # (1/sqrt(DH) already folded into the Q columns of wqkv / bqkv.)
    qkv = jnp.einsum('bsh,hd->bsd', xb, wqkv_ref[...],
                     preferred_element_type=jnp.float32) + bqkv     # (B, S, 3H)

    # --- multi-head attention: heads stacked into the batch dim --------------
    # Single concatenate builds all of q/k/v head-batched at once.
    qkv_hb = jnp.concatenate(
        [qkv[:, :, j * DH:(j + 1) * DH] for j in range(3 * NH)], axis=0)
    qs = qkv_hb[0 * NH * B:1 * NH * B]   # (NH*B, S, DH), head-major
    ks = qkv_hb[1 * NH * B:2 * NH * B]
    vs = qkv_hb[2 * NH * B:3 * NH * B]

    s = jnp.einsum('bqd,bkd->bqk', qs, ks,
                   preferred_element_type=jnp.float32)              # (NH*B, S, S)
    m = jnp.max(s, axis=-1, keepdims=True)
    e = jnp.exp(s - m)
    p = e * pl.reciprocal(jnp.sum(e, axis=-1, keepdims=True), approx=True)
    ctx = jnp.einsum('bqk,bkd->bqd', p, vs,
                     preferred_element_type=jnp.float32)            # (NH*B, S, DH)

    # Re-assemble heads along the lane dim -> ONE full-width output projection.
    ctx_b = jnp.concatenate([ctx[h * B:(h + 1) * B] for h in range(NH)],
                            axis=-1)                                # (B, S, H)
    attn = jnp.einsum('bsh,hk->bsk', ctx_b.astype(jnp.bfloat16), wo_ref[...],
                      preferred_element_type=jnp.float32) + bo

    x1 = _ln(x + attn, g1, be1)

    # --- FFN ------------------------------------------------------------------
    x1b = x1.astype(jnp.bfloat16)
    hmid = _gelu(jnp.einsum('bsh,hi->bsi', x1b, w1_ref[...],
                            preferred_element_type=jnp.float32) + b1)
    ffn = jnp.einsum('bsi,ih->bsh', hmid.astype(jnp.bfloat16), w2_ref[...],
                     preferred_element_type=jnp.float32) + b2

    x2 = _ln(x1 + ffn, g2, be2)
    x_ref[...] = x2

    # --- pooler + classifier + cross-entropy, fused into the last grid step ---
    @pl.when(layer == pl.num_programs(0) - 1)
    def _():
        cls3 = x2[:, 0:1, :]                                        # (B, 1, H)
        pooled = jnp.tanh(
            jnp.einsum('bsh,hk->bsk', cls3, wp_ref[...],
                       preferred_element_type=jnp.float32) + bp_ref[...])
        logits3 = jnp.einsum('bsh,hk->bsk', pooled, wc_ref[...],
                             preferred_element_type=jnp.float32) + bc_ref[...]
        mx = jnp.max(logits3, axis=-1, keepdims=True)
        lse = mx + jnp.log(jnp.sum(jnp.exp(logits3 - mx), axis=-1, keepdims=True))
        nll = lse - jnp.sum(onehot_ref[...] * logits3, axis=-1, keepdims=True)
        # TODO(synk): loss/logits are lane-narrow -> masked stores; negligible.
        loss_ref[...] = jnp.broadcast_to(jnp.mean(nll), (1, 1))
        logits_ref[...] = logits3


# ----------------------------- wrapper ---------------------------------------
def encoder_and_head(emb, params, onehot):
    """All layers + embedding LN + classifier head in ONE pallas_call."""
    enc = params['enc']

    def carried(shape):
        n = len(shape)
        return pl.BlockSpec(shape, lambda l, n=n: (0,) * n)

    def per_layer(name):
        tail = enc[name].shape[1:]
        return pl.BlockSpec((None,) + tail,
                            lambda l, k=len(tail): (l,) + (0,) * k)

    in_specs = [
        carried((B, S, H)), carried((1, H)), carried((1, H)),      # emb, emb LN
        per_layer('wqkv'), per_layer('wo'),
        per_layer('w1'), per_layer('w2'), per_layer('vecs'),        # layer weights
        carried((H, H)), carried((1, H)),                           # pooler
        carried((H, L)), carried((1, L)),                           # classifier
        carried((B, 1, L)),                                         # onehot labels
    ]
    out_specs = (carried((1, 1)), carried((B, 1, L)))

    loss2d, logits3 = pl.pallas_call(
        encoder_head_kernel,
        out_shape=(jax.ShapeDtypeStruct((1, 1), jnp.float32),
                   jax.ShapeDtypeStruct((B, 1, L), jnp.float32)),
        grid=(NLAYERS,),
        in_specs=in_specs,
        out_specs=out_specs,
        scratch_shapes=[pltpu.VMEM((B, S, H), jnp.float32)],   # activation carry
        # Layer axis is a sequential carry -> "arbitrary". vmem_limit_bytes
        # left at default: this toy config uses <1 MiB of VMEM.
        compiler_params=pltpu.CompilerParams(
            dimension_semantics=("arbitrary",)),
    )(emb, params['emb_ln_g'], params['emb_ln_b'],
      enc['wqkv'], enc['wo'], enc['w1'], enc['w2'], enc['vecs'],
      params['wp'], params['bp'], params['wc'], params['bc'], onehot)
    return loss2d[0, 0], logits3.reshape(B, L)


# ----------------------------- params ---------------------------------------
def init_params(key):
    def nrm(k, shape):
        return jax.random.normal(k, shape, jnp.float32) * 0.02

    keys = jax.random.split(key, 5 + NLAYERS)
    p = {
        'word_emb': nrm(keys[0], (VOCAB, H)),
        'pos_emb': nrm(keys[1], (MAXPOS, H)),
        'type_emb': nrm(keys[2], (NTYPE, H)),
        'emb_ln_g': jnp.ones((1, H), jnp.float32),
        'emb_ln_b': jnp.zeros((1, H), jnp.float32),
        'wp': nrm(keys[3], (H, H)),
        'bp': jnp.zeros((1, H), jnp.float32),
        'wc': nrm(keys[4], (H, L)),
        'bc': jnp.zeros((1, L), jnp.float32),
    }

    scale = 1.0 / math.sqrt(DH)   # folded into Q weights/bias at init time

    def row(v):                   # pad a (1, w) vector to the packed width
        return jnp.pad(v, ((0, 0), (0, VW - v.shape[1])))

    wqkv_l, wo_l, w1_l, w2_l, vecs_l = [], [], [], [], []
    for li in range(NLAYERS):
        lk = jax.random.split(keys[5 + li], 6)
        wq, wk, wv = nrm(lk[0], (H, H)), nrm(lk[1], (H, H)), nrm(lk[2], (H, H))
        bq = jnp.zeros((1, H), jnp.float32)
        bk = jnp.zeros((1, H), jnp.float32)
        bv = jnp.zeros((1, H), jnp.float32)

        wqkv_l.append(jnp.concatenate([wq * scale, wk, wv], axis=1))
        wo_l.append(nrm(lk[3], (H, H)))
        w1_l.append(nrm(lk[4], (H, I)))
        w2_l.append(nrm(lk[5], (I, H)))

        rows = [
            row(jnp.concatenate([bq * scale, bk, bv], axis=1)),   # 0 bqkv (1,3H)
            row(jnp.zeros((1, H), jnp.float32)),                   # 1 bo
            row(jnp.ones((1, H), jnp.float32)),                    # 2 ln1_g
            row(jnp.zeros((1, H), jnp.float32)),                   # 3 ln1_b
            row(jnp.zeros((1, I), jnp.float32)),                   # 4 b1 (1,I)
            row(jnp.zeros((1, H), jnp.float32)),                   # 5 b2
            row(jnp.ones((1, H), jnp.float32)),                    # 6 ln2_g
            row(jnp.zeros((1, H), jnp.float32)),                   # 7 ln2_b
        ]
        vecs_l.append(jnp.concatenate(rows, axis=0))               # (VROWS, VW)

    p['enc'] = {
        'wqkv': jnp.stack(wqkv_l).astype(jnp.bfloat16),   # (NL, H, 3H)
        'wo': jnp.stack(wo_l).astype(jnp.bfloat16),       # (NL, H, H)
        'w1': jnp.stack(w1_l).astype(jnp.bfloat16),       # (NL, H, I)
        'w2': jnp.stack(w2_l).astype(jnp.bfloat16),       # (NL, I, H)
        'vecs': jnp.stack(vecs_l),                        # (NL, VROWS, VW) f32
    }
    return p


# ----------------------------- model ---------------------------------------
def bert_forward(params, input_ids, labels):
    """Mirrors BertForSequenceClassification(text, labels)[:2] -> (loss, logits)."""
    # ---- embeddings (gathers are XLA glue; LayerNorm fused into grid step 0) ----
    word = jnp.take(params['word_emb'], input_ids, axis=0)          # (B, S, H)
    pos = params['pos_emb'][:S][None, :, :]                          # (1, S, H)
    tok = params['type_emb'][0][None, None, :]                       # (1, 1, H)
    emb = word + pos + tok
    # TODO(synk): dropout omitted and token_type/attention_mask assumed
    # trivial (eval-mode, all-zero type ids, all-ones mask).

    onehot = jax.nn.one_hot(labels, L, dtype=jnp.float32)[:, None, :]  # (B,1,L)

    # ---- encoder + pooler + classifier + loss: one pipelined pallas_call ----
    loss, logits = encoder_and_head(emb, params, onehot)
    return loss, logits


# ----------------------------- main ---------------------------------------
if __name__ == "__main__":
    key = jax.random.PRNGKey(0)
    kp, kid, klab = jax.random.split(key, 3)

    params = init_params(kp)
    input_ids = jax.random.randint(kid, (B, S), 0, VOCAB, dtype=jnp.int32)
    labels = jax.random.randint(klab, (B,), 0, L, dtype=jnp.int32)

    loss, logits = jax.jit(bert_forward)(params, input_ids, labels)
    jax.block_until_ready((loss, logits))

    assert loss.shape == () and logits.shape == (B, L)
    assert bool(jnp.isfinite(loss)) and bool(jnp.all(jnp.isfinite(logits)))
    print("KERNEL_OK")
</pallas_src>

<mosaic_0001>
module attributes {stable_mosaic.version = 11 : i64} {
  func.func @encoder_head_kernel(%arg0: i32, %arg1: memref<2x8x32xf32, #tpu.memory_space<vmem>>, %arg2: memref<1x32xf32, #tpu.memory_space<vmem>>, %arg3: memref<1x32xf32, #tpu.memory_space<vmem>>, %arg4: memref<1x32x96xbf16, #tpu.memory_space<vmem>>, %arg5: memref<1x32x32xbf16, #tpu.memory_space<vmem>>, %arg6: memref<1x32x64xbf16, #tpu.memory_space<vmem>>, %arg7: memref<1x64x32xbf16, #tpu.memory_space<vmem>>, %arg8: memref<1x8x96xf32, #tpu.memory_space<vmem>>, %arg9: memref<32x32xf32, #tpu.memory_space<vmem>>, %arg10: memref<1x32xf32, #tpu.memory_space<vmem>>, %arg11: memref<32x2xf32, #tpu.memory_space<vmem>>, %arg12: memref<1x2xf32, #tpu.memory_space<vmem>>, %arg13: memref<2x1x2xf32, #tpu.memory_space<vmem>>, %arg14: memref<1x1xf32, #tpu.memory_space<vmem>>, %arg15: memref<2x1x2xf32, #tpu.memory_space<vmem>>, %arg16: memref<2x8x32xf32, #tpu.memory_space<vmem>>) attributes {dimension_semantics = [#tpu.dimension_semantics<arbitrary>], iteration_bounds = array<i64: 2>, scalar_prefetch = 0 : i64, scratch_operands = 1 : i64, tpu.core_type = #tpu.core_type<tc>, window_params = [{pipeline_mode = #tpu.pipeline_mode<synchronous>, transform_indices = @transform_0, window_bounds = array<i64: 2, 8, 32>}, {pipeline_mode = #tpu.pipeline_mode<synchronous>, transform_indices = @transform_1, window_bounds = array<i64: 1, 32>}, {pipeline_mode = #tpu.pipeline_mode<synchronous>, transform_indices = @transform_2, window_bounds = array<i64: 1, 32>}, {transform_indices = @transform_3, window_bounds = array<i64: 1, 32, 96>}, {transform_indices = @transform_4, window_bounds = array<i64: 1, 32, 32>}, {transform_indices = @transform_5, window_bounds = array<i64: 1, 32, 64>}, {transform_indices = @transform_6, window_bounds = array<i64: 1, 64, 32>}, {transform_indices = @transform_7, window_bounds = array<i64: 1, 8, 96>}, {pipeline_mode = #tpu.pipeline_mode<synchronous>, transform_indices = @transform_8, window_bounds = array<i64: 32, 32>}, {pipeline_mode = #tpu.pipeline_mode<synchronous>, transform_indices = @transform_9, window_bounds = array<i64: 1, 32>}, {pipeline_mode = #tpu.pipeline_mode<synchronous>, transform_indices = @transform_10, window_bounds = array<i64: 32, 2>}, {pipeline_mode = #tpu.pipeline_mode<synchronous>, transform_indices = @transform_11, window_bounds = array<i64: 1, 2>}, {pipeline_mode = #tpu.pipeline_mode<synchronous>, transform_indices = @transform_12, window_bounds = array<i64: 2, 1, 2>}, {pipeline_mode = #tpu.pipeline_mode<synchronous>, transform_indices = @transform_13, window_bounds = array<i64: 1, 1>}, {pipeline_mode = #tpu.pipeline_mode<synchronous>, transform_indices = @transform_14, window_bounds = array<i64: 2, 1, 2>}]} {
    %c0_i32 = arith.constant 0 : i32
    %0 = arith.cmpi eq, %arg0, %c0_i32 : i32
    %1 = arith.extui %0 : i1 to i32
    %c0_i32_0 = arith.constant 0 : i32
    %2 = arith.cmpi ne, %1, %c0_i32_0 : i32
    scf.if %2 {
      %c0_43 = arith.constant 0 : index
      %c0_44 = arith.constant 0 : index
      %c0_45 = arith.constant 0 : index
      %142 = vector.load %arg1[%c0_43, %c0_44, %c0_45] : memref<2x8x32xf32, #tpu.memory_space<vmem>>, vector<2x8x32xf32>
      %c0_46 = arith.constant 0 : index
      %c0_47 = arith.constant 0 : index
      %143 = vector.load %arg2[%c0_46, %c0_47] : memref<1x32xf32, #tpu.memory_space<vmem>>, vector<1x32xf32>
      %c0_48 = arith.constant 0 : index
      %c0_49 = arith.constant 0 : index
      %144 = vector.load %arg3[%c0_48, %c0_49] : memref<1x32xf32, #tpu.memory_space<vmem>>, vector<1x32xf32>
      %cst_50 = arith.constant dense<0.000000e+00> : vector<2x8xf32>
      %145 = vector.multi_reduction <add>, %142, %cst_50 [2] : vector<2x8x32xf32> to vector<2x8xf32>
      %146 = vector.shape_cast %145 : vector<2x8xf32> to vector<2x8x1xf32>
      %cst_51 = arith.constant 3.200000e+01 : f32
      %147 = vector.broadcast %cst_51 : f32 to vector<2x8x1xf32>
      %148 = arith.divf %146, %147 : vector<2x8x1xf32>
      %149 = vector.broadcast %148 : vector<2x8x1xf32> to vector<2x8x32xf32>
      %150 = arith.subf %142, %149 : vector<2x8x32xf32>
      %151 = arith.mulf %150, %150 : vector<2x8x32xf32>
      %cst_52 = arith.constant dense<0.000000e+00> : vector<2x8xf32>
      %152 = vector.multi_reduction <add>, %151, %cst_52 [2] : vector<2x8x32xf32> to vector<2x8xf32>
      %153 = vector.shape_cast %152 : vector<2x8xf32> to vector<2x8x1xf32>
      %cst_53 = arith.constant 3.200000e+01 : f32
      %154 = vector.broadcast %cst_53 : f32 to vector<2x8x1xf32>
      %155 = arith.divf %153, %154 : vector<2x8x1xf32>
      %156 = vector.broadcast %148 : vector<2x8x1xf32> to vector<2x8x32xf32>
      %157 = arith.subf %142, %156 : vector<2x8x32xf32>
      %cst_54 = arith.constant 9.99999996E-13 : f32
      %158 = vector.broadcast %cst_54 : f32 to vector<2x8x1xf32>
      %159 = arith.addf %155, %158 : vector<2x8x1xf32>
      %160 = math.rsqrt %159 : vector<2x8x1xf32>
      %161 = vector.broadcast %160 : vector<2x8x1xf32> to vector<2x8x32xf32>
      %162 = arith.mulf %157, %161 : vector<2x8x32xf32>
      %163 = vector.shape_cast %143 : vector<1x32xf32> to vector<1x1x32xf32>
      %164 = vector.broadcast %163 : vector<1x1x32xf32> to vector<2x8x32xf32>
      %165 = arith.mulf %162, %164 : vector<2x8x32xf32>
      %166 = vector.shape_cast %144 : vector<1x32xf32> to vector<1x1x32xf32>
      %167 = vector.broadcast %166 : vector<1x1x32xf32> to vector<2x8x32xf32>
      %168 = arith.addf %165, %167 : vector<2x8x32xf32>
      %c0_55 = arith.constant 0 : index
      %c0_56 = arith.constant 0 : index
      %c0_57 = arith.constant 0 : index
      %169 = vector.load %arg16[%c0_55, %c0_56, %c0_57] : memref<2x8x32xf32, #tpu.memory_space<vmem>>, vector<2x8x32xf32>
      tpu.vector_store %arg16[%c0_55, %c0_56, %c0_57], %168 {strides = array<i32>} : memref<2x8x32xf32, #tpu.memory_space<vmem>>, vector<2x8x32xf32>,
    } else {
    }
    %c0 = arith.constant 0 : index
    %c0_1 = arith.constant 0 : index
    %c0_2 = arith.constant 0 : index
    %3 = vector.load %arg16[%c0, %c0_1, %c0_2] : memref<2x8x32xf32, #tpu.memory_space<vmem>>, vector<2x8x32xf32>
    %4 = arith.truncf %3 : vector<2x8x32xf32> to vector<2x8x32xbf16>
    %c0_3 = arith.constant 0 : index
    %c0_4 = arith.constant 0 : index
    %c0_5 = arith.constant 0 : index
    %5 = vector.load %arg8[%c0_3, %c0_4, %c0_5] : memref<1x8x96xf32, #tpu.memory_space<vmem>>, vector<1x8x96xf32>
    %6 = vector.shape_cast %5 : vector<1x8x96xf32> to vector<8x96xf32>
    %7 = vector.extract_strided_slice %6 {offsets = [0, 0], sizes = [1, 96], strides = [1, 1]} : vector<8x96xf32> to vector<1x96xf32>
    %8 = vector.extract_strided_slice %6 {offsets = [1, 0], sizes = [1, 32], strides = [1, 1]} : vector<8x96xf32> to vector<1x32xf32>
    %9 = vector.extract_strided_slice %6 {offsets = [2, 0], sizes = [1, 32], strides = [1, 1]} : vector<8x96xf32> to vector<1x32xf32>
    %10 = vector.extract_strided_slice %6 {offsets = [3, 0], sizes = [1, 32], strides = [1, 1]} : vector<8x96xf32> to vector<1x32xf32>
    %11 = vector.extract_strided_slice %6 {offsets = [4, 0], sizes = [1, 64], strides = [1, 1]} : vector<8x96xf32> to vector<1x64xf32>
    %12 = vector.extract_strided_slice %6 {offsets = [5, 0], sizes = [1, 32], strides = [1, 1]} : vector<8x96xf32> to vector<1x32xf32>
    %13 = vector.extract_strided_slice %6 {offsets = [6, 0], sizes = [1, 32], strides = [1, 1]} : vector<8x96xf32> to vector<1x32xf32>
    %14 = vector.extract_strided_slice %6 {offsets = [7, 0], sizes = [1, 32], strides = [1, 1]} : vector<8x96xf32> to vector<1x32xf32>
    %c0_6 = arith.constant 0 : index
    %c0_7 = arith.constant 0 : index
    %c0_8 = arith.constant 0 : index
    %15 = vector.load %arg4[%c0_6, %c0_7, %c0_8] : memref<1x32x96xbf16, #tpu.memory_space<vmem>>, vector<1x32x96xbf16>
    %16 = vector.shape_cast %15 : vector<1x32x96xbf16> to vector<32x96xbf16>
    "tpu.trace_start"() <{level = 10 : i32, message = "bsh,hd->bsd"}> : () -> ()
    %cst = arith.constant dense<0.000000e+00> : vector<2x8x96xf32>
    %17 = tpu.matmul %4, %16, %cst {dimension_numbers = #tpu.dot_dimension_numbers<[2], [0], [0, 1], [1], [0, 0, 0, 1, 1, 1], [], []>} : vector<2x8x32xbf16>, vector<32x96xbf16>, vector<2x8x96xf32> -> vector<2x8x96xf32>
    "tpu.trace_stop"() : () -> ()
    %18 = vector.shape_cast %7 : vector<1x96xf32> to vector<1x1x96xf32>
    %19 = vector.broadcast %18 : vector<1x1x96xf32> to vector<2x8x96xf32>
    %20 = arith.addf %17, %19 : vector<2x8x96xf32>
    %21 = vector.extract_strided_slice %20 {offsets = [0, 0, 0], sizes = [2, 8, 8], strides = [1, 1, 1]} : vector<2x8x96xf32> to vector<2x8x8xf32>
    %22 = vector.extract_strided_slice %20 {offsets = [0, 0, 8], sizes = [2, 8, 8], strides = [1, 1, 1]} : vector<2x8x96xf32> to vector<2x8x8xf32>
    %23 = vector.extract_strided_slice %20 {offsets = [0, 0, 16], sizes = [2, 8, 8], strides = [1, 1, 1]} : vector<2x8x96xf32> to vector<2x8x8xf32>
    %24 = vector.extract_strided_slice %20 {offsets = [0, 0, 24], sizes = [2, 8, 8], strides = [1, 1, 1]} : vector<2x8x96xf32> to vector<2x8x8xf32>
    %25 = vector.extract_strided_slice %20 {offsets = [0, 0, 32], sizes = [2, 8, 8], strides = [1, 1, 1]} : vector<2x8x96xf32> to vector<2x8x8xf32>
    %26 = vector.extract_strided_slice %20 {offsets = [0, 0, 40], sizes = [2, 8, 8], strides = [1, 1, 1]} : vector<2x8x96xf32> to vector<2x8x8xf32>
    %27 = vector.extract_strided_slice %20 {offsets = [0, 0, 48], sizes = [2, 8, 8], strides = [1, 1, 1]} : vector<2x8x96xf32> to vector<2x8x8xf32>
    %28 = vector.extract_strided_slice %20 {offsets = [0, 0, 56], sizes = [2, 8, 8], strides = [1, 1, 1]} : vector<2x8x96xf32> to vector<2x8x8xf32>
    %29 = vector.extract_strided_slice %20 {offsets = [0, 0, 64], sizes = [2, 8, 8], strides = [1, 1, 1]} : vector<2x8x96xf32> to vector<2x8x8xf32>
    %30 = vector.extract_strided_slice %20 {offsets = [0, 0, 72], sizes = [2, 8, 8], strides = [1, 1, 1]} : vector<2x8x96xf32> to vector<2x8x8xf32>
    %31 = vector.extract_strided_slice %20 {offsets = [0, 0, 80], sizes = [2, 8, 8], strides = [1, 1, 1]} : vector<2x8x96xf32> to vector<2x8x8xf32>
    %32 = vector.extract_strided_slice %20 {offsets = [0, 0, 88], sizes = [2, 8, 8], strides = [1, 1, 1]} : vector<2x8x96xf32> to vector<2x8x8xf32>
    %33 = tpu.concatenate %21, %22, %23, %24, %25, %26, %27, %28, %29, %30, %31, %32 in 0 : vector<2x8x8xf32>, vector<2x8x8xf32>, vector<2x8x8xf32>, vector<2x8x8xf32>, vector<2x8x8xf32>, vector<2x8x8xf32>, vector<2x8x8xf32>, vector<2x8x8xf32>, vector<2x8x8xf32>, vector<2x8x8xf32>, vector<2x8x8xf32>, vector<2x8x8xf32> -> vector<24x8x8xf32>
    %34 = vector.extract_strided_slice %33 {offsets = [0, 0, 0], sizes = [8, 8, 8], strides = [1, 1, 1]} : vector<24x8x8xf32> to vector<8x8x8xf32>
    %35 = vector.extract_strided_slice %33 {offsets = [8, 0, 0], sizes = [8, 8, 8], strides = [1, 1, 1]} : vector<24x8x8xf32> to vector<8x8x8xf32>
    %36 = vector.extract_strided_slice %33 {offsets = [16, 0, 0], sizes = [8, 8, 8], strides = [1, 1, 1]} : vector<24x8x8xf32> to vector<8x8x8xf32>
    "tpu.trace_start"() <{level = 10 : i32, message = "bqd,bkd->bqk"}> : () -> ()
    %cst_9 = arith.constant dense<0.000000e+00> : vector<8x8x8xf32>
    %37 = tpu.matmul %34, %35, %cst_9 {dimension_numbers = #tpu.dot_dimension_numbers<[2], [2], [1], [1], [0, 0, 0, 1, 1, 1], [0], [0]>} : vector<8x8x8xf32>, vector<8x8x8xf32>, vector<8x8x8xf32> -> vector<8x8x8xf32>
    "tpu.trace_stop"() : () -> ()
    %cst_10 = arith.constant dense<0xFF800000> : vector<8x8xf32>
    %38 = vector.multi_reduction <maximumf>, %37, %cst_10 [2] : vector<8x8x8xf32> to vector<8x8xf32>
    %39 = vector.shape_cast %38 : vector<8x8xf32> to vector<8x8x1xf32>
    %40 = vector.broadcast %39 : vector<8x8x1xf32> to vector<8x8x8xf32>
    %41 = arith.subf %37, %40 : vector<8x8x8xf32>
    %42 = math.exp %41 : vector<8x8x8xf32>
    %cst_11 = arith.constant dense<0.000000e+00> : vector<8x8xf32>
    %43 = vector.multi_reduction <add>, %42, %cst_11 [2] : vector<8x8x8xf32> to vector<8x8xf32>
    %44 = vector.shape_cast %43 : vector<8x8xf32> to vector<8x8x1xf32>
    %45 = tpu.reciprocal %44 {approx = true} : vector<8x8x1xf32> -> vector<8x8x1xf32>
    %46 = vector.broadcast %45 : vector<8x8x1xf32> to vector<8x8x8xf32>
    %47 = arith.mulf %42, %46 : vector<8x8x8xf32>
    "tpu.trace_start"() <{level = 10 : i32, message = "bqk,bkd->bqd"}> : () -> ()
    %cst_12 = arith.constant dense<0.000000e+00> : vector<8x8x8xf32>
    %48 = tpu.matmul %47, %36, %cst_12 {dimension_numbers = #tpu.dot_dimension_numbers<[2], [1], [1], [2], [0, 0, 0, 1, 1, 2], [0], [0]>} : vector<8x8x8xf32>, vector<8x8x8xf32>, vector<8x8x8xf32> -> vector<8x8x8xf32>
    "tpu.trace_stop"() : () -> ()
    %49 = vector.extract_strided_slice %48 {offsets = [0, 0, 0], sizes = [2, 8, 8], strides = [1, 1, 1]} : vector<8x8x8xf32> to vector<2x8x8xf32>
    %50 = vector.extract_strided_slice %48 {offsets = [2, 0, 0], sizes = [2, 8, 8], strides = [1, 1, 1]} : vector<8x8x8xf32> to vector<2x8x8xf32>
    %51 = vector.extract_strided_slice %48 {offsets = [4, 0, 0], sizes = [2, 8, 8], strides = [1, 1, 1]} : vector<8x8x8xf32> to vector<2x8x8xf32>
    %52 = vector.extract_strided_slice %48 {offsets = [6, 0, 0], sizes = [2, 8, 8], strides = [1, 1, 1]} : vector<8x8x8xf32> to vector<2x8x8xf32>
    %53 = tpu.concatenate %49, %50, %51, %52 in 2 : vector<2x8x8xf32>, vector<2x8x8xf32>, vector<2x8x8xf32>, vector<2x8x8xf32> -> vector<2x8x32xf32>
    %54 = arith.truncf %53 : vector<2x8x32xf32> to vector<2x8x32xbf16>
    %c0_13 = arith.constant 0 : index
    %c0_14 = arith.constant 0 : index
    %c0_15 = arith.constant 0 : index
    %55 = vector.load %arg5[%c0_13, %c0_14, %c0_15] : memref<1x32x32xbf16, #tpu.memory_space<vmem>>, vector<1x32x32xbf16>
    %56 = vector.shape_cast %55 : vector<1x32x32xbf16> to vector<32x32xbf16>
    "tpu.trace_start"() <{level = 10 : i32, message = "bsh,hk->bsk"}> : () -> ()
    %cst_16 = arith.constant dense<0.000000e+00> : vector<2x8x32xf32>
    %57 = tpu.matmul %54, %56, %cst_16 {dimension_numbers = #tpu.dot_dimension_numbers<[2], [0], [0, 1], [1], [0, 0, 0, 1, 1, 1], [], []>} : vector<2x8x32xbf16>, vector<32x32xbf16>, vector<2x8x32xf32> -> vector<2x8x32xf32>
    "tpu.trace_stop"() : () -> ()
    %58 = vector.shape_cast %8 : vector<1x32xf32> to vector<1x1x32xf32>
    %59 = vector.broadcast %58 : vector<1x1x32xf32> to vector<2x8x32xf32>
    %60 = arith.addf %57, %59 : vector<2x8x32xf32>
    %61 = arith.addf %3, %60 : vector<2x8x32xf32>
    %cst_17 = arith.constant dense<0.000000e+00> : vector<2x8xf32>
    %62 = vector.multi_reduction <add>, %61, %cst_17 [2] : vector<2x8x32xf32> to vector<2x8xf32>
    %63 = vector.shape_cast %62 : vector<2x8xf32> to vector<2x8x1xf32>
    %cst_18 = arith.constant 3.200000e+01 : f32
    %64 = vector.broadcast %cst_18 : f32 to vector<2x8x1xf32>
    %65 = arith.divf %63, %64 : vector<2x8x1xf32>
    %66 = vector.broadcast %65 : vector<2x8x1xf32> to vector<2x8x32xf32>
    %67 = arith.subf %61, %66 : vector<2x8x32xf32>
    %68 = arith.mulf %67, %67 : vector<2x8x32xf32>
    %cst_19 = arith.constant dense<0.000000e+00> : vector<2x8xf32>
    %69 = vector.multi_reduction <add>, %68, %cst_19 [2] : vector<2x8x32xf32> to vector<2x8xf32>
    %70 = vector.shape_cast %69 : vector<2x8xf32> to vector<2x8x1xf32>
    %cst_20 = arith.constant 3.200000e+01 : f32
    %71 = vector.broadcast %cst_20 : f32 to vector<2x8x1xf32>
    %72 = arith.divf %70, %71 : vector<2x8x1xf32>
    %73 = vector.broadcast %65 : vector<2x8x1xf32> to vector<2x8x32xf32>
    %74 = arith.subf %61, %73 : vector<2x8x32xf32>
    %cst_21 = arith.constant 9.99999996E-13 : f32
    %75 = vector.broadcast %cst_21 : f32 to vector<2x8x1xf32>
    %76 = arith.addf %72, %75 : vector<2x8x1xf32>
    %77 = math.rsqrt %76 : vector<2x8x1xf32>
    %78 = vector.broadcast %77 : vector<2x8x1xf32> to vector<2x8x32xf32>
    %79 = arith.mulf %74, %78 : vector<2x8x32xf32>
    %80 = vector.shape_cast %9 : vector<1x32xf32> to vector<1x1x32xf32>
    %81 = vector.broadcast %80 : vector<1x1x32xf32> to vector<2x8x32xf32>
    %82 = arith.mulf %79, %81 : vector<2x8x32xf32>
    %83 = vector.shape_cast %10 : vector<1x32xf32> to vector<1x1x32xf32>
    %84 = vector.broadcast %83 : vector<1x1x32xf32> to vector<2x8x32xf32>
    %85 = arith.addf %82, %84 : vector<2x8x32xf32>
    %86 = arith.truncf %85 : vector<2x8x32xf32> to vector<2x8x32xbf16>
    %c0_22 = arith.constant 0 : index
    %c0_23 = arith.constant 0 : index
    %c0_24 = arith.constant 0 : index
    %87 = vector.load %arg6[%c0_22, %c0_23, %c0_24] : memref<1x32x64xbf16, #tpu.memory_space<vmem>>, vector<1x32x64xbf16>
    %88 = vector.shape_cast %87 : vector<1x32x64xbf16> to vector<32x64xbf16>
    "tpu.trace_start"() <{level = 10 : i32, message = "bsh,hi->bsi"}> : () -> ()
    %cst_25 = arith.constant dense<0.000000e+00> : vector<2x8x64xf32>
    %89 = tpu.matmul %86, %88, %cst_25 {dimension_numbers = #tpu.dot_dimension_numbers<[2], [0], [0, 1], [1], [0, 0, 0, 1, 1, 1], [], []>} : vector<2x8x32xbf16>, vector<32x64xbf16>, vector<2x8x64xf32> -> vector<2x8x64xf32>
    "tpu.trace_stop"() : () -> ()
    %90 = vector.shape_cast %11 : vector<1x64xf32> to vector<1x1x64xf32>
    %91 = vector.broadcast %90 : vector<1x1x64xf32> to vector<2x8x64xf32>
    %92 = arith.addf %89, %91 : vector<2x8x64xf32>
    %cst_26 = arith.constant 5.000000e-01 : f32
    %93 = vector.broadcast %cst_26 : f32 to vector<2x8x64xf32>
    %94 = arith.mulf %93, %92 : vector<2x8x64xf32>
    %cst_27 = arith.constant 4.471500e-02 : f32
    %95 = vector.broadcast %cst_27 : f32 to vector<2x8x64xf32>
    %96 = arith.mulf %95, %92 : vector<2x8x64xf32>
    %97 = arith.mulf %96, %92 : vector<2x8x64xf32>
    %98 = arith.mulf %97, %92 : vector<2x8x64xf32>
    %99 = arith.addf %92, %98 : vector<2x8x64xf32>
    %cst_28 = arith.constant 0.797884583 : f32
    %100 = vector.broadcast %cst_28 : f32 to vector<2x8x64xf32>
    %101 = arith.mulf %100, %99 : vector<2x8x64xf32>
    %102 = math.tanh %101 : vector<2x8x64xf32>
    %cst_29 = arith.constant 1.000000e+00 : f32
    %103 = vector.broadcast %cst_29 : f32 to vector<2x8x64xf32>
    %104 = arith.addf %103, %102 : vector<2x8x64xf32>
    %105 = arith.mulf %94, %104 : vector<2x8x64xf32>
    %106 = arith.truncf %105 : vector<2x8x64xf32> to vector<2x8x64xbf16>
    %c0_30 = arith.constant 0 : index
    %c0_31 = arith.constant 0 : index
    %c0_32 = arith.constant 0 : index
    %107 = vector.load %arg7[%c0_30, %c0_31, %c0_32] : memref<1x64x32xbf16, #tpu.memory_space<vmem>>, vector<1x64x32xbf16>
    %108 = vector.shape_cast %107 : vector<1x64x32xbf16> to vector<64x32xbf16>
    "tpu.trace_start"() <{level = 10 : i32, message = "bsi,ih->bsh"}> : () -> ()
    %cst_33 = arith.constant dense<0.000000e+00> : vector<2x8x32xf32>
    %109 = tpu.matmul %106, %108, %cst_33 {dimension_numbers = #tpu.dot_dimension_numbers<[2], [0], [0, 1], [1], [0, 0, 0, 1, 1, 1], [], []>} : vector<2x8x64xbf16>, vector<64x32xbf16>, vector<2x8x32xf32> -> vector<2x8x32xf32>
    "tpu.trace_stop"() : () -> ()
    %110 = vector.shape_cast %12 : vector<1x32xf32> to vector<1x1x32xf32>
    %111 = vector.broadcast %110 : vector<1x1x32xf32> to vector<2x8x32xf32>
    %112 = arith.addf %109, %111 : vector<2x8x32xf32>
    %113 = arith.addf %85, %112 : vector<2x8x32xf32>
    %cst_34 = arith.constant dense<0.000000e+00> : vector<2x8xf32>
    %114 = vector.multi_reduction <add>, %113, %cst_34 [2] : vector<2x8x32xf32> to vector<2x8xf32>
    %115 = vector.shape_cast %114 : vector<2x8xf32> to vector<2x8x1xf32>
    %cst_35 = arith.constant 3.200000e+01 : f32
    %116 = vector.broadcast %cst_35 : f32 to vector<2x8x1xf32>
    %117 = arith.divf %115, %116 : vector<2x8x1xf32>
    %118 = vector.broadcast %117 : vector<2x8x1xf32> to vector<2x8x32xf32>
    %119 = arith.subf %113, %118 : vector<2x8x32xf32>
    %120 = arith.mulf %119, %119 : vector<2x8x32xf32>
    %cst_36 = arith.constant dense<0.000000e+00> : vector<2x8xf32>
    %121 = vector.multi_reduction <add>, %120, %cst_36 [2] : vector<2x8x32xf32> to vector<2x8xf32>
    %122 = vector.shape_cast %121 : vector<2x8xf32> to vector<2x8x1xf32>
    %cst_37 = arith.constant 3.200000e+01 : f32
    %123 = vector.broadcast %cst_37 : f32 to vector<2x8x1xf32>
    %124 = arith.divf %122, %123 : vector<2x8x1xf32>
    %125 = vector.broadcast %117 : vector<2x8x1xf32> to vector<2x8x32xf32>
    %126 = arith.subf %113, %125 : vector<2x8x32xf32>
    %cst_38 = arith.constant 9.99999996E-13 : f32
    %127 = vector.broadcast %cst_38 : f32 to vector<2x8x1xf32>
    %128 = arith.addf %124, %127 : vector<2x8x1xf32>
    %129 = math.rsqrt %128 : vector<2x8x1xf32>
    %130 = vector.broadcast %129 : vector<2x8x1xf32> to vector<2x8x32xf32>
    %131 = arith.mulf %126, %130 : vector<2x8x32xf32>
    %132 = vector.shape_cast %13 : vector<1x32xf32> to vector<1x1x32xf32>
    %133 = vector.broadcast %132 : vector<1x1x32xf32> to vector<2x8x32xf32>
    %134 = arith.mulf %131, %133 : vector<2x8x32xf32>
    %135 = vector.shape_cast %14 : vector<1x32xf32> to vector<1x1x32xf32>
    %136 = vector.broadcast %135 : vector<1x1x32xf32> to vector<2x8x32xf32>
    %137 = arith.addf %134, %136 : vector<2x8x32xf32>
    %c0_39 = arith.constant 0 : index
    %c0_40 = arith.constant 0 : index
    %c0_41 = arith.constant 0 : index
    %138 = vector.load %arg16[%c0_39, %c0_40, %c0_41] : memref<2x8x32xf32, #tpu.memory_space<vmem>>, vector<2x8x32xf32>
    tpu.vector_store %arg16[%c0_39, %c0_40, %c0_41], %137 {strides = array<i32>} : memref<2x8x32xf32, #tpu.memory_space<vmem>>, vector<2x8x32xf32>,
    %c1_i32 = arith.constant 1 : i32
    %139 = arith.cmpi eq, %arg0, %c1_i32 : i32
    %140 = arith.extui %139 : i1 to i32
    %c0_i32_42 = arith.constant 0 : i32
    %141 = arith.cmpi ne, %140, %c0_i32_42 : i32
    scf.if %141 {
      %142 = vector.extract_strided_slice %137 {offsets = [0, 0, 0], sizes = [2, 1, 32], strides = [1, 1, 1]} : vector<2x8x32xf32> to vector<2x1x32xf32>
      %c0_43 = arith.constant 0 : index
      %c0_44 = arith.constant 0 : index
      %143 = vector.load %arg9[%c0_43, %c0_44] : memref<32x32xf32, #tpu.memory_space<vmem>>, vector<32x32xf32>
      "tpu.trace_start"() <{level = 10 : i32, message = "bsh,hk->bsk"}> : () -> ()
      %cst_45 = arith.constant dense<0.000000e+00> : vector<2x1x32xf32>
      %144 = tpu.matmul %142, %143, %cst_45 {dimension_numbers = #tpu.dot_dimension_numbers<[2], [0], [0, 1], [1], [0, 0, 0, 1, 1, 1], [], []>} : vector<2x1x32xf32>, vector<32x32xf32>, vector<2x1x32xf32> -> vector<2x1x32xf32>
      "tpu.trace_stop"() : () -> ()
      %c0_46 = arith.constant 0 : index
      %c0_47 = arith.constant 0 : index
      %145 = vector.load %arg10[%c0_46, %c0_47] : memref<1x32xf32, #tpu.memory_space<vmem>>, vector<1x32xf32>
      %146 = vector.shape_cast %145 : vector<1x32xf32> to vector<1x1x32xf32>
      %147 = vector.broadcast %146 : vector<1x1x32xf32> to vector<2x1x32xf32>
      %148 = arith.addf %144, %147 : vector<2x1x32xf32>
      %149 = math.tanh %148 : vector<2x1x32xf32>
      %c0_48 = arith.constant 0 : index
      %c0_49 = arith.constant 0 : index
      %150 = vector.load %arg11[%c0_48, %c0_49] : memref<32x2xf32, #tpu.memory_space<vmem>>, vector<32x2xf32>
      "tpu.trace_start"() <{level = 10 : i32, message = "bsh,hk->bsk"}> : () -> ()
      %cst_50 = arith.constant dense<0.000000e+00> : vector<2x1x2xf32>
      %151 = tpu.matmul %149, %150, %cst_50 {dimension_numbers = #tpu.dot_dimension_numbers<[2], [0], [0, 1], [1], [0, 0, 0, 1, 1, 1], [], []>} : vector<2x1x32xf32>, vector<32x2xf32>, vector<2x1x2xf32> -> vector<2x1x2xf32>
      "tpu.trace_stop"() : () -> ()
      %c0_51 = arith.constant 0 : index
      %c0_52 = arith.constant 0 : index
      %152 = vector.load %arg12[%c0_51, %c0_52] : memref<1x2xf32, #tpu.memory_space<vmem>>, vector<1x2xf32>
      %153 = vector.shape_cast %152 : vector<1x2xf32> to vector<1x1x2xf32>
      %154 = vector.broadcast %153 : vector<1x1x2xf32> to vector<2x1x2xf32>
      %155 = arith.addf %151, %154 : vector<2x1x2xf32>
      %cst_53 = arith.constant dense<0xFF800000> : vector<2x1xf32>
      %156 = vector.multi_reduction <maximumf>, %155, %cst_53 [2] : vector<2x1x2xf32> to vector<2x1xf32>
      %157 = vector.shape_cast %156 : vector<2x1xf32> to vector<2x1x1xf32>
      %158 = vector.broadcast %157 : vector<2x1x1xf32> to vector<2x1x2xf32>
      %159 = arith.subf %155, %158 : vector<2x1x2xf32>
      %160 = math.exp %159 : vector<2x1x2xf32>
      %cst_54 = arith.constant dense<0.000000e+00> : vector<2x1xf32>
      %161 = vector.multi_reduction <add>, %160, %cst_54 [2] : vector<2x1x2xf32> to vector<2x1xf32>
      %162 = vector.shape_cast %161 : vector<2x1xf32> to vector<2x1x1xf32>
      %163 = math.log %162 : vector<2x1x1xf32>
      %164 = arith.addf %157, %163 : vector<2x1x1xf32>
      %c0_55 = arith.constant 0 : index
      %c0_56 = arith.constant 0 : index
      %c0_57 = arith.constant 0 : index
      %165 = vector.load %arg13[%c0_55, %c0_56, %c0_57] : memref<2x1x2xf32, #tpu.memory_space<vmem>>, vector<2x1x2xf32>
      %166 = arith.mulf %165, %155 : vector<2x1x2xf32>
      %cst_58 = arith.constant dense<0.000000e+00> : vector<2x1xf32>
      %167 = vector.multi_reduction <add>, %166, %cst_58 [2] : vector<2x1x2xf32> to vector<2x1xf32>
      %168 = vector.shape_cast %167 : vector<2x1xf32> to vector<2x1x1xf32>
      %169 = arith.subf %164, %168 : vector<2x1x1xf32>
      %170 = vector.shape_cast %169 : vector<2x1x1xf32> to vector<1x2x1x1xf32>
      %cst_59 = arith.constant dense<0.000000e+00> : vector<1xf32>
      %171 = vector.multi_reduction <add>, %170, %cst_59 [1, 2, 3] : vector<1x2x1x1xf32> to vector<1xf32>
      %172 = vector.shape_cast %171 : vector<1xf32> to vector<1x1x1x1xf32>
      %173 = vector.extract %172[0, 0, 0, 0] : f32 from vector<1x1x1x1xf32>
      %cst_60 = arith.constant 2.000000e+00 : f32
      %174 = arith.divf %173, %cst_60 : f32
      %175 = vector.broadcast %174 : f32 to vector<1x1xf32>
      %c0_61 = arith.constant 0 : index
      %c0_62 = arith.constant 0 : index
      %176 = vector.load %arg14[%c0_61, %c0_62] : memref<1x1xf32, #tpu.memory_space<vmem>>, vector<1x1xf32>
      tpu.vector_store %arg14[%c0_61, %c0_62], %175 {strides = array<i32>} : memref<1x1xf32, #tpu.memory_space<vmem>>, vector<1x1xf32>,
      %c0_63 = arith.constant 0 : index
      %c0_64 = arith.constant 0 : index
      %c0_65 = arith.constant 0 : index
      %177 = vector.load %arg15[%c0_63, %c0_64, %c0_65] : memref<2x1x2xf32, #tpu.memory_space<vmem>>, vector<2x1x2xf32>
      tpu.vector_store %arg15[%c0_63, %c0_64, %c0_65], %155 {strides = array<i32>} : memref<2x1x2xf32, #tpu.memory_space<vmem>>, vector<2x1x2xf32>,
    } else {
    }
    return
  }
  func.func @transform_0(%arg0: i32) -> (i32, i32, i32) {
    %c0_i32 = arith.constant 0 : i32
    %c0_i32_0 = arith.constant 0 : i32
    %c0_i32_1 = arith.constant 0 : i32
    %c0_i32_2 = arith.constant 0 : i32
    return %c0_i32, %c0_i32_0, %c0_i32_1 : i32, i32, i32
  }
  func.func @transform_1(%arg0: i32) -> (i32, i32) {
    %c0_i32 = arith.constant 0 : i32
    %c0_i32_0 = arith.constant 0 : i32
    %c0_i32_1 = arith.constant 0 : i32
    return %c0_i32, %c0_i32_0 : i32, i32
  }
  func.func @transform_2(%arg0: i32) -> (i32, i32) {
    %c0_i32 = arith.constant 0 : i32
    %c0_i32_0 = arith.constant 0 : i32
    %c0_i32_1 = arith.constant 0 : i32
    return %c0_i32, %c0_i32_0 : i32, i32
  }
  func.func @transform_3(%arg0: i32) -> (i32, i32, i32) {
    %c0_i32 = arith.constant 0 : i32
    %c0_i32_0 = arith.constant 0 : i32
    %c0_i32_1 = arith.constant 0 : i32
    return %arg0, %c0_i32, %c0_i32_0 : i32, i32, i32
  }
  func.func @transform_4(%arg0: i32) -> (i32, i32, i32) {
    %c0_i32 = arith.constant 0 : i32
    %c0_i32_0 = arith.constant 0 : i32
    %c0_i32_1 = arith.constant 0 : i32
    return %arg0, %c0_i32, %c0_i32_0 : i32, i32, i32
  }
  func.func @transform_5(%arg0: i32) -> (i32, i32, i32) {
    %c0_i32 = arith.constant 0 : i32
    %c0_i32_0 = arith.constant 0 : i32
    %c0_i32_1 = arith.constant 0 : i32
    return %arg0, %c0_i32, %c0_i32_0 : i32, i32, i32
  }
  func.func @transform_6(%arg0: i32) -> (i32, i32, i32) {
    %c0_i32 = arith.constant 0 : i32
    %c0_i32_0 = arith.constant 0 : i32
    %c0_i32_1 = arith.constant 0 : i32
    return %arg0, %c0_i32, %c0_i32_0 : i32, i32, i32
  }
  func.func @transform_7(%arg0: i32) -> (i32, i32, i32) {
    %c0_i32 = arith.constant 0 : i32
    %c0_i32_0 = arith.constant 0 : i32
    %c0_i32_1 = arith.constant 0 : i32
    return %arg0, %c0_i32, %c0_i32_0 : i32, i32, i32
  }
  func.func @transform_8(%arg0: i32) -> (i32, i32) {
    %c0_i32 = arith.constant 0 : i32
    %c0_i32_0 = arith.constant 0 : i32
    %c0_i32_1 = arith.constant 0 : i32
    return %c0_i32, %c0_i32_0 : i32, i32
  }
  func.func @transform_9(%arg0: i32) -> (i32, i32) {
    %c0_i32 = arith.constant 0 : i32
    %c0_i32_0 = arith.constant 0 : i32
    %c0_i32_1 = arith.constant 0 : i32
    return %c0_i32, %c0_i32_0 : i32, i32
  }
  func.func @transform_10(%arg0: i32) -> (i32, i32) {
    %c0_i32 = arith.constant 0 : i32
    %c0_i32_0 = arith.constant 0 : i32
    %c0_i32_1 = arith.constant 0 : i32
    return %c0_i32, %c0_i32_0 : i32, i32
  }
  func.func @transform_11(%arg0: i32) -> (i32, i32) {
    %c0_i32 = arith.constant 0 : i32
    %c0_i32_0 = arith.constant 0 : i32
    %c0_i32_1 = arith.constant 0 : i32
    return %c0_i32, %c0_i32_0 : i32, i32
  }
  func.func @transform_12(%arg0: i32) -> (i32, i32, i32) {
    %c0_i32 = arith.constant 0 : i32
    %c0_i32_0 = arith.constant 0 : i32
    %c0_i32_1 = arith.constant 0 : i32
    %c0_i32_2 = arith.constant 0 : i32
    return %c0_i32, %c0_i32_0, %c0_i32_1 : i32, i32, i32
  }
  func.func @transform_13(%arg0: i32) -> (i32, i32) {
    %c0_i32 = arith.constant 0 : i32
    %c0_i32_0 = arith.constant 0 : i32
    %c0_i32_1 = arith.constant 0 : i32
    return %c0_i32, %c0_i32_0 : i32, i32
  }
  func.func @transform_14(%arg0: i32) -> (i32, i32, i32) {
    %c0_i32 = arith.constant 0 : i32
    %c0_i32_0 = arith.constant 0 : i32
    %c0_i32_1 = arith.constant 0 : i32
    %c0_i32_2 = arith.constant 0 : i32
    return %c0_i32, %c0_i32_0, %c0_i32_1 : i32, i32, i32
  }
}

</mosaic_0001>

<bundles_post_ra>
// kernel: bert_forward.1
= control target key start
LH: loop header
LB: loop body
LE: loop exit
PB: predicated region body
PF: predicated region fallthrough
CT: control target
= control target key end

     0   :  { %s3720_s0 = inlined_call_operand.vmem [shape: f32[2,8,32], index: 0, kind: input, shape index: {}]   ;;  %s3721_s1 = inlined_call_operand.vmem [shape: f32[1,32], index: 1, kind: input, shape index: {}]   ;;  %s3722_s2 = inlined_call_operand.vmem [shape: f32[1,32], index: 2, kind: input, shape index: {}]   ;;  %s3723_s3 = inlined_call_operand.vmem [shape: bf16[2,32,96], index: 3, kind: input, shape index: {}]   ;;  %s3724_s4 = inlined_call_operand.vmem [shape: bf16[2,32,32], index: 4, kind: input, shape index: {}]   ;;  %s3725_s5 = inlined_call_operand.vmem [shape: bf16[2,32,64], index: 5, kind: input, shape index: {}]   ;;  %s3726_s6 = inlined_call_operand.vmem [shape: bf16[2,64,32], index: 6, kind: input, shape index: {}]   ;;  %s3727_s7 = inlined_call_operand.vmem [shape: f32[2,8,96], index: 7, kind: input, shape index: {}]   ;;  %s3728_s8 = inlined_call_operand.vmem [shape: f32[32,32], index: 8, kind: input, shape index: {}]   ;;  %s3729_s9 = inlined_call_operand.vmem [shape: f32[1,32], index: 9, kind: input, shape index: {}]   ;;  %s3730_s10 = inlined_call_operand.vmem [shape: f32[32,2], index: 10, kind: input, shape index: {}]   ;;  %s3731_s11 = inlined_call_operand.vmem [shape: f32[1,2], index: 11, kind: input, shape index: {}]   ;;  %s3732_s12 = inlined_call_operand.vmem [shape: f32[2,1,2], index: 12, kind: input, shape index: {}]   ;;  %s3733_s13 = inlined_call_operand.hbm [shape: f32[1,1], index: 13, kind: output, shape index: {0}]   ;;  %s3734_s14 = inlined_call_operand.hbm [shape: f32[2,1,2], index: 14, kind: output, shape index: {1}]  }
   0x1   :  { %3738 = sst [smem:[#allocation10_spill]] %s3733_s13 }
   0x2   :  { %3739 = sst [smem:[#allocation11_spill]] %s3734_s14 }
   0x3   :  { %20 = vsyncpa [#allocation4], 0 }
   0x4   :  { %21 = vsyncpa [#allocation6], 0  ;;  %s3362_s29 = smov 0  }
   0x5 LB: > { %3740 = sst [smem:[#allocation9_spill]] %s3262_s29  ;;  %s3368_s30 = sadd.s32 4294967295, %s3262_s29   ;;  %s3262_s29 = sphi %s3362_s29, %s27_s29  }
   0x6   : > { %p2786_p0 = scmp.ge.s32.totalorder %s3262_s29, 1  ;;  %p446_p1 = scmp.lt.s32.totalorder %s3262_s29, 3 }
   0x8   : > { %p447_p2 = pnand %p2786_p0, %p446_p1 }
   0x9   : > { %p506_p3 = scmp.lt.s32.totalorder (!%p447_p2), %s3368_s30, 1  ;;  %p2796_p4 = scmp.ne.s32.totalorder (!%p447_p2), %s3368_s30, 0 }
   0xa   : > { %450 = sbr.rel (%p447_p2) target bundleno = 3919 (0xf4f), region = 72 }
  0x11   : > { %s507_s15 = scalar_select %p506_p3, %s3368_s30, 1 }
  0x12   : > { %534 = sbr.rel (%p2796_p4) target bundleno = 337 (0x151), region = 76  ;;  %v535_v0 = vld [vmem:[%s3720_s0] sm:$0xff] (!%p2796_p4)  ;;  %vm539_vm0 = vcmask (!%p2796_p4), 261120   ;;  %v536_v1 = vld [vmem:[%s3720_s0 + $0x8] sm:$0xff] (!%p2796_p4) }
  0x13   : > { %s2850_s16 = sshll.u32 %s507_s15, 4  ;;  %s2853_s17 = sshll.u32 %s507_s15, 5  ;;  %v540_v2 = vsel (!%p2796_p4), %vm539_vm0, %v535_v0, 0.0  ;;  %v543_v3 = vsel (!%p2796_p4), %vm539_vm0, %v536_v1, 0.0  ;;  %v2797_v21 = vld [vmem:[%s3721_s1] ss:$0 sm:$0xff] (!%p2796_p4) }
  0x14   : > { %s3377_s20 = scalar_lea.vmem %s3723_s3, %s2850_s16  ;;  %s3382_s23 = scalar_lea.vmem %s3724_s4, %s2850_s16  ;;  %541 = vadd.xlane.f32.xlu0 (!%p2796_p4), %v540_v2  ;;  %v2798_v23 = vld [vmem:[%s3722_s2] ss:$0 sm:$0xff] (!%p2796_p4) }
  0x15   : > { %s3387_s26 = scalar_lea.vmem %s3725_s5, %s2850_s16  ;;  %s3392_s29 = scalar_lea.vmem %s3726_s6, %s2853_s17 }
  0x16   : > { %s2795_s14 = sshll.u32 %s507_s15, 3 }
  0x17   : > { %s3397_s19 = scalar_lea.vmem %s3727_s7, %s2795_s14 }
  0x18   : > { %544 = vadd.xlane.f32.xlu0 (!%p2796_p4), %v543_v3 }
  0xa1   : > { %v542_v4 = vpop.xlane.xlu0 %541 }
  0xa2   : > { %v547_v5 = vmul.f32 0.03125, %v542_v4 }
  0xa4   : > { %v549_v6 = vsub.f32 %v535_v0, %v547_v5 }
  0xa5   : > { %v545_v7 = vpop.xlane.xlu0 %544 }
  0xa6   : > { %v548_v8 = vmul.f32 0.03125, %v545_v7  ;;  %v551_v9 = vmul.f32 %v549_v6, %v549_v6 }
  0xa8   : > { %v550_v10 = vsub.f32 %v536_v1, %v548_v8  ;;  %v553_v11 = vsel %vm539_vm0, %v551_v9, 0.0 }
  0xa9   : > { %554 = vadd.xlane.f32.xlu1 %v553_v11 }
  0xaa   : > { %v552_v12 = vmul.f32 %v550_v10, %v550_v10 }
  0xac   : > { %v556_v13 = vsel %vm539_vm0, %v552_v12, 0.0 }
  0xad   : > { %557 = vadd.xlane.f32.xlu1 %v556_v13 }
 0x136   : > { %v555_v14 = vpop.xlane.xlu1 %554 }
 0x137   : > { %v559_v15 = vmul.f32 0.03125, %v555_v14 }
 0x139   : > { %v561_v16 = vadd.f32 1e-12, %v559_v15 }
 0x13a   : > { %v558_v17 = vpop.xlane.xlu1 %557 }
 0x13b   : > { %3109 = vrsqrt.f32 %v561_v16  ;;  %v560_v18 = vmul.f32 0.03125, %v558_v17 }
 0x13d   : > { %v562_v19 = vadd.f32 1e-12, %v560_v18 }
 0x13f   : > { %3111 = vrsqrt.f32 %v562_v19 }
 0x145   : > { %v3110_v20 = vpop.eup %3109 }
 0x146   : > { %v565_v22 = vmul.f32 %v3110_v20, %v549_v6 }
 0x148   : > { %v573_v24 = vmul.f32 %v2797_v21, %v565_v22 }
 0x149   : > { %v3112_v25 = vpop.eup %3111 }
 0x14a   : > { %v581_v26 = vadd.f32 %v2798_v23, %v573_v24  ;;  %v566_v27 = vmul.f32 %v3112_v25, %v550_v10 }
 0x14c   : > { %583 = vst.msk [vmem:[#allocation2] sm:$0xff] %vm539_vm0, %v581_v26  ;;  %v574_v28 = vmul.f32 %v2797_v21, %v566_v27 }
 0x14e   : > { %v582_v29 = vadd.f32 %v2798_v23, %v574_v28 }
 0x150   : > { %584 = vst.msk [vmem:[#allocation2 + $0x8] sm:$0xff] %vm539_vm0, %v582_v29 }
 0x151 PF: > { %v3128_v30 = vld [vmem:[%s3377_s20] sm:$0xff]   ;;  %v3264_v31 = vmov 0.0   ;;  %v3129_v32 = vld [vmem:[%s3377_s20 + $0x8] sm:$0xff]   ;;  %vm3265_vm1 = vmmov 0   ;;  %vm615_vm2 = vcmask 261120   ;;  %v594_v36 = vlaneseq  ;;  %s3266_s20 = smov 88  }
 0x152   : > { %2914 = vmatprep.subr.bf16.mxu0 %v3264_v31  ;;  %2927 = vmatprep.subr.mxu1 %v3264_v31  ;;  %v3441_v39 = vld [vmem:[%s3397_s19] sm:$0xff]  ;;  %s3267_s25 = smov 96   ;;  %s3268_s27 = smov 120   ;;  %vm714_vm3 = vcmask 64512   ;;  %vm2005_vm4 = vcmask 130048   ;;  %vm2008_vm5 = vcmask 195584  }
 0x153   : > { %2915 = vmatpush3.bf16.msra.mxu0 %v3128_v30  ;;  %2918 = vmatprep.mubr.msk.bf16.mxu0 %vm3265_vm1, %v3264_v31  ;;  %v3424_v33 = vld [vmem:[#allocation2] sm:$0xff]  ;;  %v3437_v37 = vshrl.u32 %v594_v36, 7  ;;  %s3269_s28 = smov 80   ;;  %s3270_s18 = smov 112   ;;  %vm2255_vm6 = vcmask 523264  }
 0x154   : > { %2916 = vmatprep.subr.bf16.mxu0 %v3264_v31  ;;  %2929 = vmatprep.mubr.msk.f32.mxu1 %vm3265_vm1, %v3264_v31  ;;  %s3271_s19 = smov 72   ;;  %s3272_s21 = smov 104  }
 0x155   : > { %v596_v38 = vsub.s32 0, %v3437_v37  ;;  %s3273_s22 = smov 64   ;;  %s3274_s16 = smov 56  }
 0x156   : > { %s3275_s24 = smov 48   ;;  %s3276_s13 = smov 40  }
 0x157   : > { %v3426_v34 = vld [vmem:[#allocation2 + $0x8] sm:$0xff]  ;;  %2917 = vmatpush3.bf16.msra.mxu0 %v3129_v32  ;;  %v597_v40 = vrot.slane %v3441_v39, %v596_v38  ;;  %s3277_s14 = smov 8   ;;  %s3278_s15 = smov 16  }
 0x158   : > { %v2854_v35 = vpack.c.bf16 %v3426_v34, %v3424_v33  ;;  %2922 = vmatprep.subr.mxu0 %v3264_v31  ;;  %p2841_p5 = scmp.ne.s32.totalorder %s3368_s30, 1 }
 0x159   : > { %vm3281_vm7 = vmmov (!%p2841_p5), 0   ;;  %vm2354_vm8 = vcmask (!%p2841_p5), 1041409   ;;  %vm2608_vm9 = vcmask (!%p2841_p5), 8192   ;;  %vm2645_vm10 = vcmask (!%p2841_p5), 0  }
 0x15a   : > { %2919 = vmatmul.mubr.msk.bf16.vlgmr.msra.gmra.mrb[0].mxu0 %vm615_vm2, %v2854_v35 }
 0x15b   : > { %2924 = vmatprep.mubr.msk.f32.mxu0 %vm3265_vm1, %v3264_v31 }
 0x22d   : > { %v653_v41 = vpop.f32.mrb[0].mxu0 }
 0x22e   : > { %v3444_v42 = vadd.f32 %v653_v41, %v597_v40  ;;  %v2920_v43 = vpop.f32.mrb[1].mxu0 }
 0x22f   : > { %v656_v44 = vpop.f32.mrb[2].mxu0 }
 0x230   : > { %678 = vrot.lane.b32.xlu1 %v3444_v42, %s3266_s20  ;;  %674 = vrot.lane.b32.xlu0 %v3444_v42, %s3267_s25  ;;  %v2921_v45 = vpop.f32.mrb[3].mxu0  ;;  %v3448_v46 = vadd.f32 %v656_v44, %v597_v40 }
 0x234   : > { %662 = vrot.lane.b32.xlu0 %v3444_v42, %s3268_s27  ;;  %680 = vrot.lane.b32.xlu1 %v3448_v46, %s3266_s20 }
 0x238   : > { %664 = vrot.lane.b32.xlu1 %v3448_v46, %s3268_s27  ;;  %676 = vrot.lane.b32.xlu0 %v3448_v46, %s3267_s25 }
 0x23c   : > { %684 = vrot.lane.b32.xlu1 %v3448_v46, %s3269_s28  ;;  %682 = vrot.lane.b32.xlu0 %v3444_v42, %s3269_s28 }
 0x240   : > { %668 = vrot.lane.b32.xlu1 %v3448_v46, %s3270_s18  ;;  %666 = vrot.lane.b32.xlu0 %v3444_v42, %s3270_s18 }
 0x244   : > { %688 = vrot.lane.b32.xlu1 %v3448_v46, %s3271_s19  ;;  %686 = vrot.lane.b32.xlu0 %v3444_v42, %s3271_s19 }
 0x248   : > { %672 = vrot.lane.b32.xlu1 %v3448_v46, %s3272_s21  ;;  %670 = vrot.lane.b32.xlu0 %v3444_v42, %s3272_s21 }
 0x2a2   : > { %v679_v47 = vpop.permute.xlu1 %678  ;;  %v675_v48 = vpop.permute.xlu0 %674 }
 0x2a3   : > { %2923 = vmatpush3.xpose.msk.msra.mxu0 %vm714_vm3, %v675_v48 }
 0x2a4   : > { %2937 = vmatprep.subr.mxu0 %v3264_v31 }
 0x2a6   : > { %2925 = vmatmul.mubr.msk.f32.vlgmr.msra.gmra.mrb[4].mxu0 %vm714_vm3, %v3444_v42  ;;  %v663_v49 = vpop.permute.xlu0 %662  ;;  %v681_v50 = vpop.permute.xlu1 %680 }
 0x2a7   : > { %2938 = vmatpush3.xpose.msk.msra.mxu0 %vm714_vm3, %v681_v50  ;;  %2939 = vmatprep.mubr.msk.f32.mxu0 %vm3265_vm1, %v3264_v31 }
 0x2a8   : > { %2947 = vmatprep.subr.mxu0 %v3264_v31 }
 0x2aa   : > { %v665_v51 = vpop.permute.xlu1 %664  ;;  %v677_v52 = vpop.permute.xlu0 %676 }
 0x2ab   : > { %2928 = vmatpush3.xpose.msk.msra.mxu1 %vm714_vm3, %v677_v52  ;;  %2940 = vmatmul.mubr.msk.f32.vlgmr.msra.gmra.mrb[6].mxu0 %vm714_vm3, %v665_v51 }
 0x2ac   : > { %2932 = vmatprep.subr.mxu1 %v3264_v31  ;;  %2949 = vmatprep.mubr.msk.f32.mxu0 %vm3265_vm1, %v3264_v31 }
 0x2ae   : > { %v685_v53 = vpop.permute.xlu1 %684  ;;  %2930 = vmatmul.mubr.msk.f32.vlgmr.msra.gmra.mrb[0].mxu1 %vm714_vm3, %v3448_v46  ;;  %v683_v54 = vpop.permute.xlu0 %682 }
 0x2af   : > { %2933 = vmatpush3.xpose.msk.msra.mxu1 %vm714_vm3, %v679_v47  ;;  %2948 = vmatpush3.xpose.msk.msra.mxu0 %vm714_vm3, %v685_v53 }
 0x2b0   : > { %2934 = vmatprep.mubr.msk.f32.mxu1 %vm3265_vm1, %v3264_v31  ;;  %2942 = vmatprep.subr.mxu1 %v3264_v31 }
 0x2b1   : > { %2957 = vmatprep.subr.mxu0 %v3264_v31 }
 0x2b2   : > { %v669_v55 = vpop.permute.xlu1 %668  ;;  %2935 = vmatmul.mubr.msk.f32.vlgmr.msra.gmra.mrb[2].mxu1 %vm714_vm3, %v663_v49  ;;  %v667_v56 = vpop.permute.xlu0 %666 }
 0x2b3   : > { %2943 = vmatpush3.xpose.msk.msra.mxu1 %vm714_vm3, %v683_v54  ;;  %2950 = vmatmul.mubr.msk.f32.vlgmr.msra.gmra.mrb[8].mxu0 %vm714_vm3, %v669_v55 }
 0x2b4   : > { %2944 = vmatprep.mubr.msk.f32.mxu1 %vm3265_vm1, %v3264_v31  ;;  %2952 = vmatprep.subr.mxu1 %v3264_v31 }
 0x2b5   : > { %2959 = vmatprep.mubr.msk.f32.mxu0 %vm3265_vm1, %v3264_v31 }
 0x2b6   : > { %v689_v57 = vpop.permute.xlu1 %688  ;;  %2945 = vmatmul.mubr.msk.f32.vlgmr.msra.gmra.mrb[4].mxu1 %vm714_vm3, %v667_v56  ;;  %v687_v58 = vpop.permute.xlu0 %686 }
 0x2b7   : > { %2953 = vmatpush3.xpose.msk.msra.mxu1 %vm714_vm3, %v687_v58  ;;  %2958 = vmatpush3.xpose.msk.msra.mxu0 %vm714_vm3, %v689_v57 }
 0x2b8   : > { %2954 = vmatprep.mubr.msk.f32.mxu1 %vm3265_vm1, %v3264_v31  ;;  %2962 = vmatprep.subr.mxu1 %v3264_v31 }
 0x2b9   : > { %2967 = vmatprep.subr.mxu0 %v3264_v31 }
 0x2ba   : > { %v673_v59 = vpop.permute.xlu1 %672  ;;  %v671_v60 = vpop.permute.xlu0 %670 }
 0x2bb   : > { %2955 = vmatmul.mubr.msk.f32.vlgmr.msra.gmra.mrb[6].mxu1 %vm714_vm3, %v671_v60  ;;  %2960 = vmatmul.mubr.msk.f32.vlgmr.msra.gmra.mrb[10].mxu0 %vm714_vm3, %v673_v59 }
 0x2bc   : > { %2964 = vmatprep.mubr.msk.f32.mxu1 %vm3265_vm1, %v3264_v31  ;;  %2969 = vmatprep.mubr.msk.f32.mxu0 %vm3265_vm1, %v3264_v31 }
 0x379   : > { %v785_v61 = vpop.f32.mrb[4].mxu0 }
 0x37a   : > { %v2926_v62 = vpop.f32.mrb[5].mxu0  ;;  %v1307_v63 = vsel %vm714_vm3, %v785_v61, -inf }
 0x37b   : > { %1308 = vmax.xlane.f32.xlu0 %v1307_v63 }
 0x37e   : > { %v1007_v0 = vpop.f32.mrb[6].mxu0 }
 0x37f   : > { %v2941_v1 = vpop.f32.mrb[7].mxu0  ;;  %v1316_v2 = vsel %vm714_vm3, %v1007_v0, -inf }
 0x380   : > { %1317 = vmax.xlane.f32.xlu0 %v1316_v2 }
 0x381   : > { %v859_v3 = vpop.f32.mrb[0].mxu1 }
 0x382   : > { %v2931_v4 = vpop.f32.mrb[1].mxu1  ;;  %v1310_v5 = vsel %vm714_vm3, %v859_v3, -inf }
 0x383   : > { %1311 = vmax.xlane.f32.xlu1 %v1310_v5 }
 0x385   : > { %v933_v6 = vpop.f32.mrb[2].mxu1 }
 0x386   : > { %v2936_v7 = vpop.f32.mrb[3].mxu1  ;;  %v1155_v8 = vpop.f32.mrb[8].mxu0  ;;  %v1313_v9 = vsel %vm714_vm3, %v933_v6, -inf }
 0x387   : > { %1314 = vmax.xlane.f32.xlu0 %v1313_v9  ;;  %v2951_v10 = vpop.f32.mrb[9].mxu0  ;;  %v1322_v14 = vsel %vm714_vm3, %v1155_v8, -inf }
 0x389   : > { %v1081_v11 = vpop.f32.mrb[4].mxu1 }
 0x38a   : > { %v2946_v12 = vpop.f32.mrb[5].mxu1  ;;  %v1319_v13 = vsel %vm714_vm3, %v1081_v11, -inf }
 0x38b   : > { %1320 = vmax.xlane.f32.xlu1 %v1319_v13  ;;  %1323 = vmax.xlane.f32.xlu0 %v1322_v14 }
 0x38e   : > { %v1229_v15 = vpop.f32.mrb[6].mxu1  ;;  %v1303_v16 = vpop.f32.mrb[10].mxu0 }
 0x38f   : > { %v2956_v17 = vpop.f32.mrb[7].mxu1  ;;  %v2961_v18 = vpop.f32.mrb[11].mxu0  ;;  %v1325_v19 = vsel %vm714_vm3, %v1229_v15, -inf  ;;  %v1328_v20 = vsel %vm714_vm3, %v1303_v16, -inf }
 0x390   : > { %1326 = vmax.xlane.f32.xlu1 %v1325_v19  ;;  %1329 = vmax.xlane.f32.xlu0 %v1328_v20 }
 0x3a1   : > { %690 = vrot.lane.b32.xlu1 %v3444_v42, %s3273_s22 }
 0x3a5   : > { %696 = vrot.lane.b32.xlu1 %v3444_v42, %s3274_s16 }
 0x3a6   : > { %692 = vrot.lane.b32.xlu0 %v3448_v46, %s3273_s22 }
 0x3a9   : > { %698 = vrot.lane.b32.xlu1 %v3448_v46, %s3274_s16 }
 0x3aa   : > { %702 = vrot.lane.b32.xlu0 %v3444_v42, %s3275_s24 }
 0x3ad   : > { %704 = vrot.lane.b32.xlu1 %v3448_v46, %s3275_s24 }
 0x408   : > { %v1309_v21 = vpop.xlane.xlu0 %1308 }
 0x409   : > { %v1331_v22 = vsub.f32 %v785_v61, %v1309_v21 }
 0x40b   : > { %v1339_v23 = vmul.f32 1.442695, %v1331_v22 }
 0x40d   : > { %3138 = vpow2.f32 %v1339_v23  ;;  %v1318_v24 = vpop.xlane.xlu0 %1317 }
 0x40e   : > { %v1334_v25 = vsub.f32 %v1007_v0, %v1318_v24 }
 0x410   : > { %v1312_v26 = vpop.xlane.xlu1 %1311  ;;  %v1345_v28 = vmul.f32 1.442695, %v1334_v25 }
 0x411   : > { %v1332_v27 = vsub.f32 %v859_v3, %v1312_v26 }
 0x413   : > { %v1341_v29 = vmul.f32 1.442695, %v1332_v27 }
 0x414   : > { %v1315_v30 = vpop.xlane.xlu0 %1314 }
 0x415   : > { %3140 = vpow2.f32 %v1341_v29  ;;  %v1333_v32 = vsub.f32 %v933_v6, %v1315_v30 }
 0x416   : > { %3142 = vpow2.f32 %v1345_v28 }
 0x417   : > { %v3139_v35 = vpop.eup %3138  ;;  %v1343_v36 = vmul.f32 1.442695, %v1333_v32 }
 0x418   : > { %v1321_v38 = vpop.xlane.xlu1 %1320  ;;  %v1324_v40 = vpop.xlane.xlu0 %1323  ;;  %v1355_v41 = vsel %vm714_vm3, %v3139_v35, 0.0 }
 0x419   : > { %3144 = vpow2.f32 %v1343_v36  ;;  %v1335_v43 = vsub.f32 %v1081_v11, %v1321_v38  ;;  %v1336_v44 = vsub.f32 %v1155_v8, %v1324_v40  ;;  %1356 = vadd.xlane.f32.xlu1 %v1355_v41 }
 0x41b   : > { %v1347_v45 = vmul.f32 1.442695, %v1335_v43  ;;  %v1349_v47 = vmul.f32 1.442695, %v1336_v44  ;;  %v3130_v44 = vld [vmem:[%s3382_s23] sm:$0xff]  }
 0x41d   : > { %3146 = vpow2.f32 %v1347_v45  ;;  %v1327_v48 = vpop.xlane.xlu1 %1326  ;;  %v1330_v49 = vpop.xlane.xlu0 %1329 }
 0x41e   : > { %3148 = vpow2.f32 %v1349_v47  ;;  %v1337_v50 = vsub.f32 %v1229_v15, %v1327_v48  ;;  %v1338_v51 = vsub.f32 %v1303_v16, %v1330_v49  ;;  %v3131_v49 = vld [vmem:[%s3382_s23 + $0x8] sm:$0xff]   ;;  %s3279_s23 = smov 24  }
 0x41f   : > { %v3141_v52 = vpop.eup %3140 }
 0x420   : > { %v1351_v53 = vmul.f32 1.442695, %v1337_v50  ;;  %v1353_v54 = vmul.f32 1.442695, %v1338_v51  ;;  %v1358_v55 = vsel %vm714_vm3, %v3141_v52, 0.0  ;;  %v3520_v56 = vpop.eup %3142 }
 0x421   : > { %v691_v57 = vpop.permute.xlu1 %690  ;;  %1359 = vadd.xlane.f32.xlu0 %v1358_v55  ;;  %v693_v58 = vpop.permute.xlu0 %692  ;;  %v1364_v61 = vsel %vm714_vm3, %v3520_v56, 0.0 }
 0x422   : > { %3150 = vpow2.f32 %v1351_v53  ;;  %2963 = vmatpush3.msra.mxu1 %v691_v57  ;;  %2968 = vmatpush3.msra.mxu0 %v693_v58 }
 0x423   : > { %v3145_v59 = vpop.eup %3144  ;;  %3152 = vpow2.f32 %v1353_v54  ;;  %2972 = vmatprep.subr.mxu1 %v3264_v31  ;;  %2977 = vmatprep.subr.mxu0 %v3264_v31 }
 0x424   : > { %v1361_v60 = vsel %vm714_vm3, %v3145_v59, 0.0 }
 0x425   : > { %1362 = vadd.xlane.f32.xlu1 %v1361_v60  ;;  %1365 = vadd.xlane.f32.xlu0 %v1364_v61  ;;  %v697_v6 = vpop.permute.xlu1 %696  ;;  %v703_v10 = vpop.permute.xlu0 %702 }
 0x427   : > { %v3147_v62 = vpop.eup %3146 }
 0x428   : > { %v3149_v63 = vpop.eup %3148  ;;  %v1367_v0 = vsel %vm714_vm3, %v3147_v62, 0.0 }
 0x429   : > { %1368 = vadd.xlane.f32.xlu1 %v1367_v0  ;;  %v1370_v1 = vsel %vm714_vm3, %v3149_v63, 0.0  ;;  %v699_v7 = vpop.permute.xlu1 %698 }
 0x42a   : > { %1371 = vadd.xlane.f32.xlu0 %v1370_v1 }
 0x42c   : > { %v3529_v2 = vpop.eup %3150 }
 0x42d   : > { %v3531_v3 = vpop.eup %3152  ;;  %v1373_v4 = vsel %vm714_vm3, %v3529_v2, 0.0  ;;  %v705_v8 = vpop.permute.xlu1 %704 }
 0x42e   : > { %1374 = vadd.xlane.f32.xlu1 %v1373_v4  ;;  %v1376_v5 = vsel %vm714_vm3, %v3531_v3, 0.0 }
 0x42f   : > { %1377 = vadd.xlane.f32.xlu0 %v1376_v5 }
 0x43f   : > { %710 = vrot.lane.b32.xlu1 %v3448_v46, %s3276_s13 }
 0x445   : > { %708 = vrot.lane.b32.xlu0 %v3444_v42, %s3276_s13 }
 0x4a6   : > { %v1357_v9 = vpop.xlane.xlu1 %1356 }
 0x4a7   : > { %3154 = vrcp.f32 %v1357_v9 }
 0x4ae   : > { %v1360_v11 = vpop.xlane.xlu0 %1359 }
 0x4af   : > { %3156 = vrcp.f32 %v1360_v11 }
 0x4b1   : > { %v3155_v12 = vpop.eup %3154 }
 0x4b2   : > { %v1387_v13 = vmul.f32 %v3155_v12, %v3139_v35  ;;  %v1363_v14 = vpop.xlane.xlu1 %1362  ;;  %v1366_v15 = vpop.xlane.xlu0 %1365 }
 0x4b3   : > { %3158 = vrcp.f32 %v1363_v14  ;;  %v2019_v14 = vsub.s32 1, %v3437_v37 }
 0x4b4   : > { %3160 = vrcp.f32 %v1366_v15  ;;  %2965 = vmatmul.mubr.msk.f32.vlgmr.msra.gmra.mrb[8].mxu1 %vm714_vm3, %v1387_v13 }
 0x4b5   : > { %2973 = vmatpush3.msra.mxu1 %v697_v6  ;;  %2974 = vmatprep.mubr.msk.f32.mxu1 %vm3265_vm1, %v3264_v31  ;;  %v2020_v15 = vrot.slane %v3441_v39, %v2019_v14 }
 0x4b6   : > { %v1369_v42 = vpop.xlane.xlu1 %1368  ;;  %2982 = vmatprep.subr.mxu1 %v3264_v31 }
 0x4b7   : > { %3162 = vrcp.f32 %v1369_v42  ;;  %v1372_v46 = vpop.xlane.xlu0 %1371 }
 0x4b8   : > { %3164 = vrcp.f32 %v1372_v46 }
 0x4b9   : > { %v3157_v16 = vpop.eup %3156 }
 0x4ba   : > { %v1388_v17 = vmul.f32 %v3157_v16, %v3141_v52 }
 0x4bb   : > { %v1375_v18 = vpop.xlane.xlu1 %1374 }
 0x4bc   : > { %3166 = vrcp.f32 %v1375_v18  ;;  %v1378_v19 = vpop.xlane.xlu0 %1377  ;;  %2970 = vmatmul.mubr.msk.f32.vlgmr.msra.gmra.mrb[12].mxu0 %vm714_vm3, %v1388_v17 }
 0x4bd   : > { %v3159_v20 = vpop.eup %3158  ;;  %3168 = vrcp.f32 %v1378_v19  ;;  %2978 = vmatpush3.msra.mxu0 %v699_v7  ;;  %2979 = vmatprep.mubr.msk.f32.mxu0 %vm3265_vm1, %v3264_v31 }
 0x4be   : > { %v3161_v21 = vpop.eup %3160  ;;  %v1389_v22 = vmul.f32 %v3159_v20, %v3145_v59  ;;  %2987 = vmatprep.subr.mxu0 %v3264_v31 }
 0x4bf   : > { %v1390_v23 = vmul.f32 %v3161_v21, %v3520_v56  ;;  %v711_v29 = vpop.permute.xlu1 %710 }
 0x4c0   : > { %2975 = vmatmul.mubr.msk.f32.vlgmr.msra.gmra.mrb[10].mxu1 %vm714_vm3, %v1389_v22  ;;  %v709_v28 = vpop.permute.xlu0 %708 }
 0x4c1   : > { %v3163_v24 = vpop.eup %3162  ;;  %2980 = vmatmul.mubr.msk.f32.vlgmr.msra.gmra.mrb[14].mxu0 %vm714_vm3, %v1390_v23  ;;  %2983 = vmatpush3.msra.mxu1 %v703_v10 }
 0x4c2   : > { %v3165_v25 = vpop.eup %3164  ;;  %v1391_v26 = vmul.f32 %v3163_v24, %v3147_v62  ;;  %2988 = vmatpush3.msra.mxu0 %v705_v8  ;;  %2984 = vmatprep.mubr.msk.f32.mxu1 %vm3265_vm1, %v3264_v31 }
 0x4c3   : > { %v1392_v27 = vmul.f32 %v3165_v25, %v3149_v63  ;;  %2989 = vmatprep.mubr.msk.f32.mxu0 %vm3265_vm1, %v3264_v31  ;;  %2992 = vmatprep.subr.mxu1 %v3264_v31 }
 0x4c4   : > { %2997 = vmatprep.subr.mxu0 %v3264_v31  ;;  %2985 = vmatmul.mubr.msk.f32.vlgmr.msra.gmra.mrb[12].mxu1 %vm714_vm3, %v1391_v26 }
 0x4c5   : > { %2990 = vmatmul.mubr.msk.f32.vlgmr.msra.gmra.mrb[16].mxu0 %vm714_vm3, %v1392_v27  ;;  %2993 = vmatpush3.msra.mxu1 %v709_v28 }
 0x4c6   : > { %v3167_v30 = vpop.eup %3166  ;;  %2998 = vmatpush3.msra.mxu0 %v711_v29  ;;  %2994 = vmatprep.mubr.msk.f32.mxu1 %vm3265_vm1, %v3264_v31 }
 0x4c7   : > { %v3169_v32 = vpop.eup %3168  ;;  %v1393_v35 = vmul.f32 %v3167_v30, %v3529_v2  ;;  %2999 = vmatprep.mubr.msk.f32.mxu0 %vm3265_vm1, %v3264_v31  ;;  %3002 = vmatprep.subr.bf16.mxu1 %v3264_v31 }
 0x4c8   : > { %v1394_v36 = vmul.f32 %v3169_v32, %v3531_v3  ;;  %3010 = vmatprep.subr.bf16.mxu0 %v3264_v31 }
 0x4c9   : > { %2995 = vmatmul.mubr.msk.f32.vlgmr.msra.gmra.mrb[14].mxu1 %vm714_vm3, %v1393_v35 }
 0x4ca   : > { %3000 = vmatmul.mubr.msk.f32.vlgmr.msra.gmra.mrb[18].mxu0 %vm714_vm3, %v1394_v36  ;;  %3006 = vmatprep.mubr.msk.bf16.mxu1 %vm3265_vm1, %v3264_v31  ;;  %v3133_v36 = vld [vmem:[%s3387_s26 + $0x8] sm:$0xff]  }
 0x4cb   : > { %3014 = vmatprep.mubr.msk.bf16.mxu0 %vm3265_vm1, %v3264_v31  ;;  %3003 = vmatpush3.bf16.msra.mxu1 %v3130_v44 }
 0x4cc   : > { %3004 = vmatprep.subr.bf16.mxu1 %v3264_v31 }
 0x4cf   : > { %3005 = vmatpush3.bf16.msra.mxu1 %v3131_v49  ;;  %v2119_v49 = vsub.s32 3, %v3437_v37 }
 0x4d0   : > { %3018 = vmatprep.subr.bf16.mxu1 %v3264_v31 }
 0x587   : > { %v1464_v38 = vpop.f32.mrb[8].mxu1 }
 0x588   : > { %v2966_v40 = vpop.f32.mrb[9].mxu1 }
 0x58f   : > { %v1537_v41 = vpop.f32.mrb[12].mxu0 }
 0x590   : > { %v2971_v43 = vpop.f32.mrb[13].mxu0 }
 0x593   : > { %v1610_v45 = vpop.f32.mrb[10].mxu1 }
 0x594   : > { %v1683_v47 = vpop.f32.mrb[14].mxu0  ;;  %v2976_v48 = vpop.f32.mrb[11].mxu1 }
 0x595   : > { %v3113_v50 = vpack.i.bf16 %v1683_v47, %v1610_v45  ;;  %v2981_v51 = vpop.f32.mrb[15].mxu0  ;;  %v2113_v47 = vsub.s32 2, %v3437_v37 }
 0x597   : > { %3114 = vrot.lane.b32.xlu0 %v3113_v50, %s3277_s14  ;;  %v1756_v52 = vpop.f32.mrb[12].mxu1  ;;  %v2114_v48 = vrot.slane %v3441_v39, %v2113_v47 }
 0x598   : > { %v1829_v53 = vpop.f32.mrb[16].mxu0  ;;  %v2986_v54 = vpop.f32.mrb[13].mxu1 }
 0x599   : > { %v3118_v55 = vpack.i.bf16 %v1829_v53, %v1756_v52  ;;  %v2991_v56 = vpop.f32.mrb[17].mxu0 }
 0x59b   : > { %3119 = vrot.lane.b32.xlu1 %v3118_v55, %s3278_s15  ;;  %v2120_v55 = vrot.slane %v3441_v39, %v2119_v49 }
 0x59c   : > { %v1902_v57 = vpop.f32.mrb[14].mxu1 }
 0x59d   : > { %v1975_v58 = vpop.f32.mrb[18].mxu0  ;;  %v2996_v59 = vpop.f32.mrb[15].mxu1 }
 0x59e   : > { %v3123_v60 = vpack.i.bf16 %v1975_v58, %v1902_v57  ;;  %v3001_v61 = vpop.f32.mrb[19].mxu0 }
 0x59f   : > { %v3135_v61 = vld [vmem:[%s3392_s29 + $0x8] sm:$0xff]  }
 0x5a0   : > { %3124 = vrot.lane.b32.xlu0 %v3123_v60, %s3279_s23  ;;  %v3134_v60 = vld [vmem:[%s3392_s29] sm:$0xff]  }
 0x609   : > { %v3115_v62 = vpop.permute.xlu0 %3114 }
 0x60a   : > { %v3117_v0 = vunpack.i.h.bf16 %v3115_v62  ;;  %v3116_v1 = vunpack.i.l.bf16 %v3115_v62  ;;  %v3136_v62 = vld [vmem:[%s3392_s29 + $0x10] sm:$0xff]  }
 0x60c   : > { %v2004_v5 = vsel %vm714_vm3, %v1537_v41, %v3117_v0  ;;  %v2003_v6 = vsel %vm714_vm3, %v1464_v38, %v3116_v1  ;;  %v2131_v0 = vsub.s32 4, %v3437_v37 }
 0x60d   : > { %v3120_v63 = vpop.permute.xlu1 %3119 }
 0x60e   : > { %v3122_v2 = vunpack.i.h.bf16 %v3120_v63  ;;  %v3121_v3 = vunpack.i.l.bf16 %v3120_v63  ;;  %v3137_v63 = vld [vmem:[%s3392_s29 + $0x18] sm:$0xff]   ;;  %v2132_v1 = vrot.slane %v3441_v39, %v2131_v0 }
 0x610   : > { %v2007_v9 = vsel %vm2005_vm4, %v2004_v5, %v3122_v2  ;;  %v2006_v10 = vsel %vm2005_vm4, %v2003_v6, %v3121_v3 }
 0x612   : > { %v3125_v4 = vpop.permute.xlu0 %3124 }
 0x613   : > { %v3127_v7 = vunpack.i.h.bf16 %v3125_v4  ;;  %v3126_v8 = vunpack.i.l.bf16 %v3125_v4 }
 0x615   : > { %v2010_v11 = vsel %vm2008_vm5, %v2007_v9, %v3127_v7  ;;  %v2009_v12 = vsel %vm2008_vm5, %v2006_v10, %v3126_v8 }
 0x616   : > { %v2855_v13 = vpack.c.bf16 %v2010_v11, %v2009_v12 }
 0x618   : > { %3007 = vmatmul.mubr.msk.bf16.vlgmr.msra.gmra.mrb[16].mxu1 %vm615_vm2, %v2855_v13 }
 0x619   : > { %3026 = vmatprep.mubr.msk.bf16.mxu1 %vm3265_vm1, %v3264_v31  ;;  %3019 = vmatpush3.bf16.msra.mxu1 %v3134_v60 }
 0x61a   : > { %3020 = vmatprep.subr.bf16.mxu1 %v3264_v31 }
 0x61d   : > { %3021 = vmatpush3.bf16.msra.mxu1 %v3135_v61 }
 0x61e   : > { %3022 = vmatprep.subr.bf16.mxu1 %v3264_v31 }
 0x621   : > { %3023 = vmatpush3.bf16.msra.mxu1 %v3136_v62 }
 0x622   : > { %3024 = vmatprep.subr.bf16.mxu1 %v3264_v31 }
 0x625   : > { %3025 = vmatpush3.bf16.msra.mxu1 %v3137_v63 }
 0x6eb   : > { %v2075_v42 = vpop.f32.mrb[16].mxu1 }
 0x6ec   : > { %v2076_v46 = vadd.f32 %v2075_v42, %v2020_v15  ;;  %v3008_v16 = vpop.f32.mrb[17].mxu1 }
 0x6ed   : > { %v2078_v17 = vpop.f32.mrb[18].mxu1 }
 0x6ee   : > { %v2079_v18 = vadd.f32 %v2078_v17, %v2020_v15  ;;  %v3009_v19 = vpop.f32.mrb[19].mxu1  ;;  %v2082_v20 = vadd.f32 %v2076_v46, %v3424_v33 }
 0x6f0   : > { %v2084_v21 = vsel %vm615_vm2, %v2082_v20, 0.0  ;;  %v2083_v22 = vadd.f32 %v2079_v18, %v3426_v34  ;;  %v3132_v34 = vld [vmem:[%s3387_s26] sm:$0xff]  }
 0x6f1   : > { %2085 = vadd.xlane.f32.xlu1 %v2084_v21  ;;  %3011 = vmatpush3.bf16.msra.mxu0 %v3132_v34 }
 0x6f2   : > { %v2087_v23 = vsel %vm615_vm2, %v2083_v22, 0.0  ;;  %3012 = vmatprep.subr.bf16.mxu0 %v3264_v31 }
 0x6f3   : > { %2088 = vadd.xlane.f32.xlu0 %v2087_v23 }
 0x6f5   : > { %3013 = vmatpush3.bf16.msra.mxu0 %v3133_v36 }
 0x77e   : > { %v2086_v24 = vpop.xlane.xlu1 %2085 }
 0x77f   : > { %v2091_v25 = vmul.f32 0.03125, %v2086_v24  ;;  %v2224_v24 = vsub.s32 5, %v3437_v37 }
 0x780   : > { %v2089_v26 = vpop.xlane.xlu0 %2088 }
 0x781   : > { %v2093_v27 = vsub.f32 %v2082_v20, %v2091_v25  ;;  %v2092_v28 = vmul.f32 0.03125, %v2089_v26  ;;  %v2225_v25 = vrot.slane %v3441_v39, %v2224_v24 }
 0x783   : > { %v2094_v29 = vsub.f32 %v2083_v22, %v2092_v28  ;;  %v2095_v30 = vmul.f32 %v2093_v27, %v2093_v27 }
 0x785   : > { %v2097_v32 = vsel %vm615_vm2, %v2095_v30, 0.0  ;;  %v2096_v33 = vmul.f32 %v2094_v29, %v2094_v29 }
 0x786   : > { %2098 = vadd.xlane.f32.xlu0 %v2097_v32 }
 0x787   : > { %v2100_v35 = vsel %vm615_vm2, %v2096_v33, 0.0 }
 0x788   : > { %2101 = vadd.xlane.f32.xlu1 %v2100_v35 }
 0x813   : > { %v2099_v38 = vpop.xlane.xlu0 %2098 }
 0x814   : > { %v2103_v40 = vmul.f32 0.03125, %v2099_v38 }
 0x815   : > { %v2102_v41 = vpop.xlane.xlu1 %2101 }
 0x816   : > { %v2105_v43 = vadd.f32 1e-12, %v2103_v40  ;;  %v2104_v44 = vmul.f32 0.03125, %v2102_v41 }
 0x818   : > { %3170 = vrsqrt.f32 %v2105_v43  ;;  %v2106_v45 = vadd.f32 1e-12, %v2104_v44 }
 0x81a   : > { %3172 = vrsqrt.f32 %v2106_v45 }
 0x822   : > { %v3171_v50 = vpop.eup %3170 }
 0x823   : > { %v2109_v51 = vmul.f32 %v3171_v50, %v2093_v27 }
 0x824   : > { %v3173_v52 = vpop.eup %3172 }
 0x825   : > { %v2115_v53 = vmul.f32 %v2114_v48, %v2109_v51  ;;  %v2110_v54 = vmul.f32 %v3173_v52, %v2094_v29 }
 0x827   : > { %v2116_v56 = vmul.f32 %v2114_v48, %v2110_v54  ;;  %v2121_v57 = vadd.f32 %v2120_v55, %v2115_v53 }
 0x829   : > { %v2122_v58 = vadd.f32 %v2120_v55, %v2116_v56 }
 0x82b   : > { %v2856_v59 = vpack.c.bf16 %v2122_v58, %v2121_v57 }
 0x82d   : > { %3015 = vmatmul.mubr.msk.bf16.vlgmr.msra.gmra.mrb[20].mxu0 %vm615_vm2, %v2856_v59 }
 0x900   : > { %v2187_v2 = vpop.f32.mrb[20].mxu0 }
 0x901   : > { %v2188_v3 = vadd.f32 %v2187_v2, %v2132_v1  ;;  %v3016_v4 = vpop.f32.mrb[21].mxu0 }
 0x902   : > { %v2190_v5 = vpop.f32.mrb[22].mxu0 }
 0x903   : > { %v2196_v6 = vmul.f32 0.044715, %v2188_v3  ;;  %v2191_v7 = vadd.f32 %v2190_v5, %v2132_v1  ;;  %v3017_v8 = vpop.f32.mrb[23].mxu0  ;;  %v2194_v18 = vmul.f32 0.5, %v2188_v3  ;;  %v2346_v5 = vld [vmem:[%s3728_s8] sm:$0xff] (!%p2841_p5) }
 0x905   : > { %v2198_v9 = vmul.f32 %v2196_v6, %v2188_v3  ;;  %v2197_v10 = vmul.f32 0.044715, %v2191_v7  ;;  %v2195_v19 = vmul.f32 0.5, %v2191_v7  ;;  %v2348_v6 = vld [vmem:[%s3728_s8 + $0x10] sm:$0xff] (!%p2841_p5) }
 0x907   : > { %v2200_v11 = vmul.f32 %v2198_v9, %v2188_v3  ;;  %v2199_v12 = vmul.f32 %v2197_v10, %v2191_v7  ;;  %v2349_v9 = vld [vmem:[%s3728_s8 + $0x18] sm:$0xff] (!%p2841_p5)  ;;  %v3282_v10 = vmov (!%p2841_p5), 0.0  }
 0x908   : > { %3038 = vmatprep.mubr.msk.f32.mxu0 (!%p2841_p5), %vm3281_vm7, %v3282_v10 }
 0x909   : > { %v2202_v13 = vadd.f32 %v2200_v11, %v2188_v3  ;;  %v2201_v14 = vmul.f32 %v2199_v12, %v2191_v7  ;;  %v3056_v11 = vpack.c.bf16 (!%p2841_p5), %v2349_v9, %v2348_v6 }
 0x90b   : > { %v2204_v15 = vmul.f32 0.7978846, %v2202_v13  ;;  %v2203_v31 = vadd.f32 %v2201_v14, %v2191_v7  ;;  %v3280_v7 = vmov (!%p2841_p5), 0.0|0.0   ;;  %v2472_v14 = vld [vmem:[%s3730_s10] sm:$0xff] (!%p2841_p5) }
 0x90c   : > { %3052 = vmatprep.subr.bf16.mxu0 (!%p2841_p5), %v3280_v7  ;;  %3058 = vmatprep.subr.bf16.mxu1 (!%p2841_p5), %v3280_v7 }
 0x90d   : > { %3174 = vtanh.f32 %v2204_v15  ;;  %v2205_v42 = vmul.f32 0.7978846, %v2203_v31  ;;  %v2473_v15 = vld [vmem:[%s3730_s10 + $0x8] sm:$0xff] (!%p2841_p5)  ;;  %v2474_v31 = vld [vmem:[%s3730_s10 + $0x10] sm:$0xff] (!%p2841_p5) }
 0x90f   : > { %3176 = vtanh.f32 %v2205_v42  ;;  %v3059_v42 = vpack.c.bf16 (!%p2841_p5), %v2473_v15, %v2472_v14 }
 0x917   : > { %v3175_v46 = vpop.eup %3174 }
 0x918   : > { %v2208_v16 = vadd.f32 1.0, %v3175_v46  ;;  %v2475_v46 = vld [vmem:[%s3730_s10 + $0x18] sm:$0xff] (!%p2841_p5) }
 0x919   : > { %v3177_v17 = vpop.eup %3176 }
 0x91a   : > { %v2209_v20 = vadd.f32 1.0, %v3177_v17  ;;  %v2210_v21 = vmul.f32 %v2208_v16, %v2194_v18  ;;  %v3062_v16 = vpack.c.bf16 (!%p2841_p5), %v2475_v46, %v2474_v31  ;;  %v3283_v17 = vmov (!%p2841_p5), 1966171168  }
 0x91b   : > { %v2359_v18 = vunpack.c.l.s4 (!%p2841_p5), %v3283_v17 }
 0x91c   : > { %v2211_v22 = vmul.f32 %v2209_v20, %v2195_v19  ;;  %v3182_v20 = vld [vmem:[%s3729_s9] ss:$0 sps:$4 sm:$0x11] (!%p2841_p5)  }
 0x91d   : > { %v2360_v19 = vunpack.c.0.s8 (!%p2841_p5), %v2359_v18 }
 0x91e   : > { %v2857_v23 = vpack.c.bf16 %v2211_v22, %v2210_v21 }
 0x91f   : > { %v2363_v21 = vsub.s32 (!%p2841_p5), %v2360_v19, %v3437_v37 }
 0x920   : > { %3027 = vmatmul.mubr.msk.bf16.vlgmr.msra.gmra.mrb[20].mxu1 %vm2255_vm6, %v2857_v23 }
 0x921   : > { %3049 = vmatprep.mubr.msk.f32.mxu1 (!%p2841_p5), %vm3281_vm7, %v3282_v10  ;;  %3060 = vmatpush3.bf16.msra.mxu1 (!%p2841_p5), %v3059_v42  ;;  %v2364_v22 = vrot.slane (!%p2841_p5), %v3182_v20, %v2363_v21 }
 0x922   : > { %3061 = vmatprep.subr.bf16.mxu1 (!%p2841_p5), %v3280_v7 }
 0x923   : > { %v2371_v23 = vrot.slane (!%p2841_p5), %v2364_v22, %v2363_v21 }
 0x925   : > { %3063 = vmatpush3.bf16.msra.mxu1 (!%p2841_p5), %v3062_v16 }
 0x9f3   : > { %v2293_v26 = vpop.f32.mrb[20].mxu1 }
 0x9f4   : > { %v2294_v27 = vadd.f32 %v2293_v26, %v2225_v25  ;;  %v3028_v28 = vpop.f32.mrb[21].mxu1 }
 0x9f5   : > { %v2296_v29 = vpop.f32.mrb[22].mxu1 }
 0x9f6   : > { %v2297_v30 = vadd.f32 %v2296_v29, %v2225_v25  ;;  %v3029_v32 = vpop.f32.mrb[23].mxu1  ;;  %v2300_v33 = vadd.f32 %v2294_v27, %v2121_v57  ;;  %v2330_v57 = vsub.s32 6, %v3437_v37 }
 0x9f8   : > { %v2302_v35 = vsel %vm615_vm2, %v2300_v33, 0.0  ;;  %v2301_v34 = vadd.f32 %v2297_v30, %v2122_v58  ;;  %v2336_v58 = vsub.s32 7, %v3437_v37  ;;  %v2331_v59 = vrot.slane %v3441_v39, %v2330_v57  ;;  %v3183_v37 = vld [vmem:[%s3731_s11] ss:$0 sps:$4 sm:$0x11] (!%p2841_p5)  }
 0x9f9   : > { %2303 = vadd.xlane.f32.xlu0 %v2302_v35 }
 0x9fa   : > { %v2305_v36 = vsel %vm615_vm2, %v2301_v34, 0.0  ;;  %v2337_v61 = vrot.slane %v3441_v39, %v2336_v58  ;;  %v2347_v39 = vld [vmem:[%s3728_s8 + $0x8] sm:$0xff] (!%p2841_p5) }
 0x9fb   : > { %2306 = vadd.xlane.f32.xlu1 %v2305_v36  ;;  %v3053_v8 = vpack.c.bf16 (!%p2841_p5), %v2347_v39, %v2346_v5 }
 0x9fd   : > { %3054 = vmatpush3.bf16.msra.mxu0 (!%p2841_p5), %v3053_v8 }
 0x9fe   : > { %3055 = vmatprep.subr.bf16.mxu0 (!%p2841_p5), %v3280_v7 }
 0xa01   : > { %3057 = vmatpush3.bf16.msra.mxu0 (!%p2841_p5), %v3056_v11 }
 0xa86   : > { %v2304_v38 = vpop.xlane.xlu0 %2303 }
 0xa87   : > { %v2308_v40 = vmul.f32 0.03125, %v2304_v38  ;;  %v2502_v38 = vrot.slane (!%p2841_p5), %v3183_v37, %v2363_v21 }
 0xa88   : > { %v2307_v41 = vpop.xlane.xlu1 %2306 }
 0xa89   : > { %v2310_v43 = vsub.f32 %v2300_v33, %v2308_v40  ;;  %v2309_v44 = vmul.f32 0.03125, %v2307_v41  ;;  %v2509_v40 = vrot.slane (!%p2841_p5), %v2502_v38, %v2363_v21 }
 0xa8b   : > { %v2311_v45 = vsub.f32 %v2301_v34, %v2309_v44  ;;  %v2312_v47 = vmul.f32 %v2310_v43, %v2310_v43 }
 0xa8d   : > { %v2314_v48 = vsel %vm615_vm2, %v2312_v47, 0.0  ;;  %v2313_v49 = vmul.f32 %v2311_v45, %v2311_v45 }
 0xa8e   : > { %2315 = vadd.xlane.f32.xlu0 %v2314_v48 }
 0xa8f   : > { %v2317_v50 = vsel %vm615_vm2, %v2313_v49, 0.0 }
 0xa90   : > { %2318 = vadd.xlane.f32.xlu1 %v2317_v50 }
 0xb1b   : > { %v2316_v51 = vpop.xlane.xlu0 %2315 }
 0xb1c   : > { %v2320_v52 = vmul.f32 0.03125, %v2316_v51  ;;  %v2633_v51 = vld [vmem:[%s3732_s12] sm:$0x1] (!%p2841_p5) }
 0xb1d   : > { %v2319_v53 = vpop.xlane.xlu1 %2318 }
 0xb1e   : > { %v2322_v54 = vadd.f32 1e-12, %v2320_v52  ;;  %v2321_v55 = vmul.f32 0.03125, %v2319_v53 }
 0xb20   : > { %3178 = vrsqrt.f32 %v2322_v54  ;;  %v2323_v56 = vadd.f32 1e-12, %v2321_v55 }
 0xb22   : > { %3180 = vrsqrt.f32 %v2323_v56 }
 0xb2a   : > { %v3179_v60 = vpop.eup %3178 }
 0xb2b   : > { %v2326_v62 = vmul.f32 %v3179_v60, %v2310_v43 }
 0xb2c   : > { %v3181_v63 = vpop.eup %3180 }
 0xb2d   : > { %v2332_v0 = vmul.f32 %v2331_v59, %v2326_v62  ;;  %v2327_v1 = vmul.f32 %v3181_v63, %v2311_v45  ;;  %2345 = sbr.rel (%p2841_p5) target bundleno = 3858 (0xf12), region = 80  ;;  %v2634_v63 = vld [vmem:[%s3732_s12 + $0x1] sm:$0x1] (!%p2841_p5) }
 0xb2f   : > { %v2338_v2 = vadd.f32 %v2337_v61, %v2332_v0  ;;  %v2333_v3 = vmul.f32 %v2331_v59, %v2327_v1 }
 0xb31   : > { %2340 = vst.msk [vmem:[#allocation2] sm:$0xff] %vm615_vm2, %v2338_v2  ;;  %v2339_v4 = vadd.f32 %v2337_v61, %v2333_v3 }
 0xb33   : > { %2341 = vst.msk [vmem:[#allocation2 + $0x8] sm:$0xff] %vm615_vm2, %v2339_v4  ;;  %v2353_v12 = vrot.slane (!%p2841_p5), %v2339_v4, 7 }
 0xb35   : > { %v2355_v13 = vsel %vm2354_vm8, %v2353_v12, %v2338_v2 }
 0xb36   : > { %3039 = vmatmul.mubr.msk.f32.vlgmr.msra.gmra.mrb[0].mxu0 %vm615_vm2, %v2355_v13 }
 0xc09   : > { %v2441_v24 = vpop.f32.mrb[0].mxu0 }
 0xc0a   : > { %v2442_v25 = vadd.f32 %v2441_v24, %v2371_v23  ;;  %v3040_v26 = vpop.f32.mrb[1].mxu0 }
 0xc0c   : > { %v2452_v27 = vrot.slane %v2442_v25, %v2363_v21 }
 0xc0e   : > { %v2453_v28 = vcombine.high %v2452_v27, %v2452_v27  ;;  %v2460_v29 = vrot.slane %v2452_v27, %v2363_v21 }
 0xc10   : > { %v2467_v30 = vrot.slane %v2453_v28, %v2363_v21  ;;  %3184 = vtanh.f32 %v2460_v29 }
 0xc12   : > { %3186 = vtanh.f32 %v2467_v30 }
 0xc1a   : > { %v3185_v32 = vpop.eup %3184 }
 0xc1c   : > { %v3187_v33 = vpop.eup %3186 }
 0xc1d   : > { %v2479_v35 = vcombine.low %v3185_v32, %v3187_v33 }
 0xc1f   : > { %v2486_v34 = vrot.slane %v2479_v35, %v2363_v21 }
 0xc21   : > { %v2493_v36 = vrot.slane %v2486_v34, %v2363_v21 }
 0xc23   : > { %3050 = vmatmul.mubr.msk.f32.vlgmr.msra.gmra.mrb[0].mxu1 %vm615_vm2, %v2493_v36 }
 0xcf6   : > { %v2579_v41 = vpop.f32.mrb[0].mxu1 }
 0xcf7   : > { %v2580_v43 = vadd.f32 %v2579_v41, %v2509_v40  ;;  %v3051_v44 = vpop.f32.mrb[1].mxu1 }
 0xcf9   : > { %v2590_v45 = vrot.slane %v2580_v43, %v2363_v21 }
 0xcfb   : > { %v2591_v47 = vcombine.high %v2590_v45, %v2590_v45  ;;  %v2598_v48 = vrot.slane %v2590_v45, %v2363_v21 }
 0xcfd   : > { %v2605_v49 = vrot.slane %v2591_v47, %v2363_v21  ;;  %2663 = vst.msk [vmem:[#allocation5] sm:$0x1] %vm2608_vm9, %v2598_v48  ;;  %v2609_v50 = vsel %vm2608_vm9, %v2598_v48, -inf  ;;  %v2635_v53 = vmul.f32 %v2633_v51, %v2598_v48 }
 0xcfe   : > { %2610 = vmax.xlane.f32.xlu0 %v2609_v50 }
 0xcff   : > { %2664 = vst.msk [vmem:[#allocation5 + $0x1] sm:$0x1] %vm2608_vm9, %v2605_v49  ;;  %v2612_v52 = vsel %vm2608_vm9, %v2605_v49, -inf  ;;  %v2637_v54 = vsel %vm2608_vm9, %v2635_v53, 0.0  ;;  %v2636_v2 = vmul.f32 %v2634_v63, %v2605_v49 }
 0xd01   : > { %v2640_v3 = vsel %vm2608_vm9, %v2636_v2, 0.0 }
 0xd02   : > { %2613 = vmax.xlane.f32.xlu0 %v2612_v52 }
 0xd06   : > { %2638 = vadd.xlane.f32.xlu0 %v2637_v54 }
 0xd8b   : > { %v2611_v55 = vpop.xlane.xlu0 %2610 }
 0xd8c   : > { %v2615_v56 = vsub.f32 %v2598_v48, %v2611_v55 }
 0xd8e   : > { %v2617_v57 = vmul.f32 1.442695, %v2615_v56 }
 0xd8f   : > { %v2614_v58 = vpop.xlane.xlu0 %2613 }
 0xd90   : > { %3188 = vpow2.f32 %v2617_v57  ;;  %v2616_v59 = vsub.f32 %v2605_v49, %v2614_v58 }
 0xd92   : > { %v2619_v60 = vmul.f32 1.442695, %v2616_v59 }
 0xd93   : > { %v2639_v10 = vpop.xlane.xlu0 %2638 }
 0xd94   : > { %3190 = vpow2.f32 %v2619_v60 }
 0xd9a   : > { %v3189_v61 = vpop.eup %3188 }
 0xd9b   : > { %v2621_v62 = vsel %vm2608_vm9, %v3189_v61, 0.0 }
 0xd9c   : > { %2622 = vadd.xlane.f32.xlu1 %v2621_v62 }
 0xd9e   : > { %v3191_v0 = vpop.eup %3190 }
 0xd9f   : > { %v2624_v1 = vsel %vm2608_vm9, %v3191_v0, 0.0 }
 0xda0   : > { %2625 = vadd.xlane.f32.xlu1 %v2624_v1 }
 0xda4   : > { %2641 = vadd.xlane.f32.xlu1 %v2640_v3 }
 0xe29   : > { %v2623_v4 = vpop.xlane.xlu1 %2622 }
 0xe2a   : > { %3192 = vlog2.f32 %v2623_v4 }
 0xe2d   : > { %v2626_v5 = vpop.xlane.xlu1 %2625 }
 0xe2e   : > { %3194 = vlog2.f32 %v2626_v5 }
 0xe31   : > { %v2642_v13 = vpop.xlane.xlu1 %2641 }
 0xe34   : > { %v3193_v39 = vpop.eup %3192 }
 0xe35   : > { %v2628_v6 = vmul.f32 0.6931472, %v3193_v39 }
 0xe37   : > { %v2631_v7 = vadd.f32 %v2628_v6, %v2611_v55 }
 0xe38   : > { %v3195_v8 = vpop.eup %3194 }
 0xe39   : > { %v2630_v9 = vmul.f32 0.6931472, %v3195_v8  ;;  %v2643_v12 = vsub.f32 %v2631_v7, %v2639_v10 }
 0xe3b   : > { %v2632_v11 = vadd.f32 %v2630_v9, %v2614_v58  ;;  %v2646_v15 = vsel %vm2645_vm10, %v2643_v12, 0.0 }
 0xe3d   : > { %v2644_v14 = vsub.f32 %v2632_v11, %v2642_v13 }
 0xe3f   : > { %v2647_v31 = vsel %vm2645_vm10, %v2644_v14, 0.0 }
 0xe40   : > { %v2648_v42 = vadd.f32 %v2647_v31, %v2646_v15 }
 0xe42   : > { %2649 = vadd.xlane.f32.xlu0 %v2648_v42 }
 0xecf   : > { %v2650_v46 = vpop.xlane.xlu0 %2649 }
 0xed0   : > { %v2651_v16 = vrot.slane %v2650_v46, 4 }
 0xed2   : > { %v2652_v17 = vadd.f32 %v2651_v16, %v2650_v46 }
 0xed4   : > { %v2653_v18 = vrot.slane %v2652_v17, 2 }
 0xed6   : > { %v2654_v19 = vadd.f32 %v2653_v18, %v2652_v17 }
 0xed8   : > { %v2655_v20 = vrot.slane %v2654_v19, 1 }
 0xeda   : > { %v2656_v21 = vadd.f32 %v2655_v20, %v2654_v19 }
 0xedc   : > { %3064 = vpush %v2656_v21 }
 0xf0d   : > { %s3065_s19 = spop %3064 }
 0xf0e   : > { %s2660_s21 = smul.f32 0.5, %s3065_s19 }
 0xf10   : > { %v2661_v22 = vstv %s2660_s21 }
 0xf11   : > { %2662 = vst.msk [vmem:[#allocation3] sm:$0x1] %vm2645_vm10, %v2661_v22 }
 0xf12 PF: > { %p3074_p6 = scmp.eq.s32.totalorder %s3368_s30, 1  ;;  %s3284_s22 = smov [#allocation3]  }
 0xf13   : > { %s2672_s16 = sshll.u32 %s3284_s22, 4  ;;  %s3285_s24 = smov [#allocation5]   ;;  %s2673_s16 = int_to_ptr.vmem [resolvable:$true] %s2672_s16 }
 0xf14   : > { %s2682_s13 = sshll.u32 %s3285_s24, 4  ;;  %s3196_s14 = scalar_lea.vmem %s2673_s16, 16  ;;  %s2683_s13 = int_to_ptr.vmem [resolvable:$true] %s2682_s13 }
 0xf15   : > { %p3197_p7 = scmp.ne.s32.totalorder %s2673_s16, %s3196_s14  ;;  %s3202_s23 = scalar_lea.vmem %s2673_s16, 32 }
 0xf16   : > { %p3203_p10 = scmp.lt.s32.totalorder %s2673_s16, %s2673_s16  ;;  %p3204_p11 = scmp.lt.s32.totalorder %s3202_s23, %s3196_s14 }
 0xf17   : > { %p3198_p8 = pnand %p3197_p7, %p3074_p6 }
 0xf18   : > { %p3205_p12 = por %p3204_p11, %p3203_p10 }
 0xf19   : > { %p3199_p9 = pneg %p3198_p8 }
 0xf1b   : > { %p3206_p13 = pnand %p3205_p12, %p3199_p9 }
 0xf1d   : > { %3209 = shalt.err (!%p3206_p13)
}
 0xf1e   : > { %s3741_s17 = sld [smem:[#allocation10_spill]] }
 0xf24   : > { %s3210_s20 = scalar_lea.hbm %s3741_s17, 16 }
 0xf25   : > { %p3211_p0 = scmp.ne.s32.totalorder %s3741_s17, %s3210_s20  ;;  %p3216_p3 = scmp.lt.u32.totalorder %s3210_s20, %s3741_s17 }
 0xf27   : > { %p3212_p1 = pnand %p3211_p0, %p3074_p6 }
 0xf29   : > { %p3213_p2 = pneg %p3212_p1 }
 0xf2b   : > { %p3218_p4 = pnand %p3216_p3, %p3213_p2 }
 0xf2d   : > { %3221 = shalt.err (!%p3218_p4)
}
 0xf2e   : > { %3067 = dma.vmem_to_hbm [thread:$0]  (%p3074_p6), %s2673_s16, 16, %s3741_s17, [#allocation4]  }
 0xf2f   : > { %s3222_s22 = scalar_lea.vmem %s2683_s13, 32  ;;  %p3229_p9 = scmp.lt.s32.totalorder %s2683_s13, %s2683_s13 }
 0xf30   : > { %p3223_p5 = scmp.ne.s32.totalorder %s2683_s13, %s3222_s22  ;;  %p3230_p10 = scmp.lt.s32.totalorder %s3222_s22, %s3222_s22 }
 0xf32   : > { %p3224_p7 = pnand %p3223_p5, %p3074_p6  ;;  %p3231_p11 = por %p3230_p10, %p3229_p9 }
 0xf34   : > { %p3225_p8 = pneg %p3224_p7 }
 0xf36   : > { %p3232_p12 = pnand %p3231_p11, %p3225_p8 }
 0xf38   : > { %3235 = shalt.err (!%p3232_p12)
}
 0xf39   : > { %s3742_s23 = sld [smem:[#allocation11_spill]] }
 0xf3f   : > { %s3236_s29 = scalar_lea.hbm %s3742_s23, 32 }
 0xf40   : > { %p3237_p13 = scmp.ne.s32.totalorder %s3742_s23, %s3236_s29  ;;  %p3242_p2 = scmp.lt.u32.totalorder %s3236_s29, %s3742_s23 }
 0xf42   : > { %p3238_p0 = pnand %p3237_p13, %p3074_p6 }
 0xf44   : > { %p3239_p1 = pneg %p3238_p0 }
 0xf46   : > { %p3244_p3 = pnand %p3242_p2, %p3239_p1 }
 0xf48   : > { %3247 = shalt.err (!%p3244_p3)
}
 0xf49   : > { %s3286_s27 = smov 1  }
 0xf4a   : > { %3069 = dma.vmem_to_hbm [thread:$0]  (%p3074_p6), %s2683_s13, 32, %s3742_s23, [#allocation6], %s3278_s15, %s3278_s15, %s3286_s27  }
 0xf4b   : > { %3253 = dma.done.wait (%p3074_p6), [#allocation4], 16  }
 0xf4c   : > { %3255 = vsyncadd (%p3074_p6), [#allocation4], 4294967280 }
 0xf4d   : > { %3257 = dma.done.wait (%p3074_p6), [#allocation6], 32  }
 0xf4e   : > { %3259 = vsyncadd (%p3074_p6), [#allocation6], 4294967264 }
 0xf4f PF: > { %s3743_s19 = sld [smem:[#allocation9_spill]] }
 0xf55   : > { %s27_s29 = sadd.s32 1, %s3743_s19  }
 0xf56   : > { %p24_p4 = scmp.ge.s32.totalorder %s27_s29, 4  }
 0xf58   :  { %26 = sbr.rel (!%p24_p4) target bundleno = 5 (0x5), region = 127 }
 0xf5f   :  { %2702 = vsyncpa [#allocation4], 1 }
 0xf60   :  { %2704 = vsyncpa [#allocation4 + $0x1], 1 }
 0xf61   :  { %2705 = vsyncpa [#allocation6], 1 }

</bundles_post_ra>
